<compile_context>
chip_gen: v6e
topology: v6e:2x2x1
jax: 0.10.0
libtpu: 0.0.40
codegen_flags: <defaults>
</compile_context>

<pallas_src>
import jax
import jax.numpy as jnp
from jax.experimental import pallas as pl
from jax.experimental.pallas import tpu as pltpu


# ----------------------------- Pallas kernels ------------------------------


def _conv_pool_relu_kernel(p_ref, w_ref, b_ref, o_ref):
    """relu(maxpool2x2(conv2d) + bias) as a transposed GEMM over 4 pool phases.

    p_ref : (4, F, TN) bf16 im2col patches, one slab per pooling phase
    w_ref : (O, F)     bf16 conv weights reshaped from OIHW
    b_ref : (O, 1)     f32  bias
    o_ref : (O, TN)    bf16 output tile (channel-major, N = h*w*batch on lanes)
    """
    w = w_ref[...]
    m = jnp.dot(w, p_ref[0], preferred_element_type=jnp.float32)
    m = jnp.maximum(m, jnp.dot(w, p_ref[1], preferred_element_type=jnp.float32))
    m = jnp.maximum(m, jnp.dot(w, p_ref[2], preferred_element_type=jnp.float32))
    m = jnp.maximum(m, jnp.dot(w, p_ref[3], preferred_element_type=jnp.float32))
    o_ref[...] = jnp.maximum(m + b_ref[...], 0.0).astype(o_ref.dtype)


def _head_kernel(x_ref, w1_ref, b1_ref, w2_ref, b2_ref, o_ref):
    """Transposed head: fc1 + ReLU + fc2 + log_softmax over classes (axis 0).

    x_ref : (3380, B) bf16 flattened conv features (columns = batch)
    w1_ref: (50, 3380) bf16, b1_ref: (50, 1) f32
    w2_ref: (4, 50)    f32,  b2_ref: (4, 1)  f32
    o_ref : (4, B)     f32 log-probabilities
    """
    h = jnp.dot(w1_ref[...], x_ref[...], preferred_element_type=jnp.float32) + b1_ref[...]
    h = jnp.maximum(h, 0.0)
    # TODO(synk): Dropout2d / F.dropout are identity in eval mode; training-mode
    # dropout masking (pltpu.prng_seed / prng_random_bits) is not implemented.
    logits = jnp.dot(w2_ref[...], h, preferred_element_type=jnp.float32) + b2_ref[...]
    m = jnp.max(logits, axis=0, keepdims=True)
    z = logits - m
    lse = jnp.log(jnp.sum(jnp.exp(z), axis=0, keepdims=True))
    o_ref[...] = z - lse


# ------------------------------ kernel wrappers ------------------------------


def conv_pool_relu_call(phases, w_mat, b_col, *, n_tile=512):
    """phases: (4, F, N) bf16, w_mat: (O, F) bf16, b_col: (O, 1) f32 -> (O, N) bf16."""
    _, f, n = phases.shape
    o = w_mat.shape[0]
    tn = n if n <= n_tile else n_tile           # full N, or a multiple of 128
    grid = (pl.cdiv(n, tn),)
    return pl.pallas_call(
        _conv_pool_relu_kernel,
        grid=grid,
        in_specs=[
            pl.BlockSpec((4, f, tn), lambda i: (0, 0, i)),   # lane-tiled over N
            pl.BlockSpec((o, f), lambda i: (0, 0)),          # weights resident
            pl.BlockSpec((o, 1), lambda i: (0, 0)),
        ],
        out_specs=pl.BlockSpec((o, tn), lambda i: (0, i)),
        out_shape=jax.ShapeDtypeStruct((o, n), jnp.bfloat16),
        compiler_params=pltpu.CompilerParams(dimension_semantics=("parallel",)),
    )(phases, w_mat, b_col)


def head_call(feats, w1, b1, w2, b2):
    k, b = feats.shape
    h = w1.shape[0]
    c = w2.shape[0]

    def full(shape):
        return pl.BlockSpec(shape, lambda i: (0,) * len(shape))

    return pl.pallas_call(
        _head_kernel,
        grid=(1,),
        in_specs=[full((k, b)), full((h, k)), full((h, 1)), full((c, h)), full((c, 1))],
        out_specs=full((c, b)),
        out_shape=jax.ShapeDtypeStruct((c, b), jnp.float32),
    )(feats, w1, b1, w2, b2)


# ------------------------------ JAX layout glue ------------------------------


def _pool_phase_patches(x_chwb, ksize):
    """im2col in (C, H, W, B) layout, split into the four 2x2 pooling phases.

    Returns (4, F, N): F ordered (c, kh, kw) to match the OIHW weight reshape,
    N ordered (h_pool, w_pool, batch) so downstream reshapes are free.
    """
    c, h, w, b = x_chwb.shape
    ho, wo = h - ksize + 1, w - ksize + 1
    hp, wp = ho // 2, wo // 2
    taps = [x_chwb[:, dy:dy + ho, dx:dx + wo, :]
            for dy in range(ksize) for dx in range(ksize)]
    pat = jnp.stack(taps, axis=1).reshape(c * ksize * ksize, ho, wo, b)
    phases = [pat[:, py::2, px::2, :].reshape(-1, hp * wp * b)
              for py in range(2) for px in range(2)]
    return jnp.stack(phases, axis=0), (hp, wp)


def cnn_med_forward(x, params):
    c1w, c1b, c2w, c2b, f1w, f1b, f2w, f2b = params
    b = x.shape[0]
    bf16 = jnp.bfloat16

    # channel-major / batch-minor activation layout: (C, H, W, B)
    xt = jnp.transpose(x, (1, 2, 3, 0)).astype(bf16)

    # conv1 + bias + maxpool(2) + relu
    ph1, (hp1, wp1) = _pool_phase_patches(xt, c1w.shape[2])          # (4, 75, 900*B)
    y1 = conv_pool_relu_call(ph1,
                             c1w.reshape(c1w.shape[0], -1).astype(bf16),
                             c1b.reshape(-1, 1))                     # (10, 900*B)
    y1 = y1.reshape(c1w.shape[0], hp1, wp1, b)                       # (10, 30, 30, B)

    # conv2 + bias + maxpool(2) + relu   (Dropout2d is identity in eval mode)
    ph2, (hp2, wp2) = _pool_phase_patches(y1, c2w.shape[2])          # (4, 250, 169*B)
    y2 = conv_pool_relu_call(ph2,
                             c2w.reshape(c2w.shape[0], -1).astype(bf16),
                             c2b.reshape(-1, 1))                     # (20, 169*B)

    # (20, 13*13*B) -> (3380, B): row order (c, h, w) == torch NCHW .view flatten.
    feats = y2.reshape(c2w.shape[0] * hp2 * wp2, b)

    out_t = head_call(feats, f1w.astype(bf16), f1b.reshape(-1, 1),
                      f2w, f2b.reshape(-1, 1))                       # (4, B)
    return out_t.T                                                   # (B, 4)


# --------------------------- pure-JAX reference ------------------------------


def reference_forward(x, params):
    c1w, c1b, c2w, c2b, f1w, f1b, f2w, f2b = params
    dn = ("NCHW", "OIHW", "NCHW")
    y = jax.lax.conv_general_dilated(x, c1w, (1, 1), "VALID", dimension_numbers=dn)
    y = y + c1b[None, :, None, None]
    y = jax.lax.reduce_window(y, -jnp.inf, jax.lax.max, (1, 1, 2, 2), (1, 1, 2, 2), "VALID")
    y = jnp.maximum(y, 0.0)
    y = jax.lax.conv_general_dilated(y, c2w, (1, 1), "VALID", dimension_numbers=dn)
    y = y + c2b[None, :, None, None]
    y = jax.lax.reduce_window(y, -jnp.inf, jax.lax.max, (1, 1, 2, 2), (1, 1, 2, 2), "VALID")
    y = jnp.maximum(y, 0.0)
    y = y.reshape(y.shape[0], -1)
    y = jnp.maximum(y @ f1w.T + f1b, 0.0)
    y = y @ f2w.T + f2b
    return jax.nn.log_softmax(y, axis=1)


# --------------------------------- main --------------------------------------

if __name__ == "__main__":
    key = jax.random.PRNGKey(0)
    ks = jax.random.split(key, 9)

    # Deterministic synthetic parameters (shapes from CnnMed.__init__).
    c1w = 0.10 * jax.random.normal(ks[0], (10, 3, 5, 5), jnp.float32)
    c1b = 0.10 * jax.random.normal(ks[1], (10,), jnp.float32)
    c2w = 0.05 * jax.random.normal(ks[2], (20, 10, 5, 5), jnp.float32)
    c2b = 0.05 * jax.random.normal(ks[3], (20,), jnp.float32)
    f1w = 0.02 * jax.random.normal(ks[4], (50, 3380), jnp.float32)
    f1b = 0.02 * jax.random.normal(ks[5], (50,), jnp.float32)
    f2w = 0.10 * jax.random.normal(ks[6], (4, 50), jnp.float32)
    f2b = 0.10 * jax.random.normal(ks[7], (4,), jnp.float32)
    params = (c1w, c1b, c2w, c2b, f1w, f1b, f2w, f2b)

    # int_layer = 3380 = 20*13*13  =>  input must be (B, 3, 64, 64). Small batch B=2.
    x = jax.random.normal(ks[8], (2, 3, 64, 64), jnp.float32)

    out = jax.block_until_ready(cnn_med_forward(x, params))
    assert out.shape == (2, 4) and out.dtype == jnp.float32

    ref = jax.block_until_ready(reference_forward(x, params))
    # bf16 conv/fc1 path vs f32 reference: keep a modest tolerance.
    assert jnp.allclose(out, ref, atol=3e-2, rtol=3e-2), (out, ref)
    # log_softmax rows must exponentiate-sum to 1 (computed in f32 in-kernel).
    assert jnp.allclose(jnp.sum(jnp.exp(out), axis=1), 1.0, atol=1e-3)

    print("KERNEL_OK")
</pallas_src>

<mosaic_0001>
module attributes {stable_mosaic.version = 11 : i64} {
  func.func @_conv_pool_relu_kernel(%arg0: i32, %arg1: memref<4x75x512xbf16, #tpu.memory_space<vmem>>, %arg2: memref<10x75xbf16, #tpu.memory_space<vmem>>, %arg3: memref<10x1xf32, #tpu.memory_space<vmem>>, %arg4: memref<10x512xbf16, #tpu.memory_space<vmem>>) attributes {dimension_semantics = [#tpu.dimension_semantics<parallel>], iteration_bounds = array<i64: 4>, scalar_prefetch = 0 : i64, scratch_operands = 0 : i64, tpu.core_type = #tpu.core_type<tc>, window_params = [{transform_indices = @transform_0, window_bounds = array<i64: 4, 75, 512>}, {pipeline_mode = #tpu.pipeline_mode<synchronous>, transform_indices = @transform_1, window_bounds = array<i64: 10, 75>}, {pipeline_mode = #tpu.pipeline_mode<synchronous>, transform_indices = @transform_2, window_bounds = array<i64: 10, 1>}, {transform_indices = @transform_3, window_bounds = array<i64: 10, 512>}]} {
    %c0 = arith.constant 0 : index
    %c0_0 = arith.constant 0 : index
    %0 = vector.load %arg2[%c0, %c0_0] : memref<10x75xbf16, #tpu.memory_space<vmem>>, vector<10x75xbf16>
    %c0_1 = arith.constant 0 : index
    %c0_2 = arith.constant 0 : index
    %c0_3 = arith.constant 0 : index
    %1 = vector.load %arg1[%c0_1, %c0_2, %c0_3] : memref<4x75x512xbf16, #tpu.memory_space<vmem>>, vector<1x75x512xbf16>
    %2 = vector.shape_cast %1 : vector<1x75x512xbf16> to vector<75x512xbf16>
    %cst = arith.constant dense<0.000000e+00> : vector<10x512xf32>
    %3 = tpu.matmul %0, %2, %cst {dimension_numbers = #tpu.dot_dimension_numbers<[1], [0], [0], [1], [0, 0, 1, 1], [], []>} : vector<10x75xbf16>, vector<75x512xbf16>, vector<10x512xf32> -> vector<10x512xf32>
    %c1 = arith.constant 1 : index
    %c0_4 = arith.constant 0 : index
    %c0_5 = arith.constant 0 : index
    %4 = vector.load %arg1[%c1, %c0_4, %c0_5] : memref<4x75x512xbf16, #tpu.memory_space<vmem>>, vector<1x75x512xbf16>
    %5 = vector.shape_cast %4 : vector<1x75x512xbf16> to vector<75x512xbf16>
    %cst_6 = arith.constant dense<0.000000e+00> : vector<10x512xf32>
    %6 = tpu.matmul %0, %5, %cst_6 {dimension_numbers = #tpu.dot_dimension_numbers<[1], [0], [0], [1], [0, 0, 1, 1], [], []>} : vector<10x75xbf16>, vector<75x512xbf16>, vector<10x512xf32> -> vector<10x512xf32>
    %7 = arith.maximumf %3, %6 : vector<10x512xf32>
    %c2 = arith.constant 2 : index
    %c0_7 = arith.constant 0 : index
    %c0_8 = arith.constant 0 : index
    %8 = vector.load %arg1[%c2, %c0_7, %c0_8] : memref<4x75x512xbf16, #tpu.memory_space<vmem>>, vector<1x75x512xbf16>
    %9 = vector.shape_cast %8 : vector<1x75x512xbf16> to vector<75x512xbf16>
    %cst_9 = arith.constant dense<0.000000e+00> : vector<10x512xf32>
    %10 = tpu.matmul %0, %9, %cst_9 {dimension_numbers = #tpu.dot_dimension_numbers<[1], [0], [0], [1], [0, 0, 1, 1], [], []>} : vector<10x75xbf16>, vector<75x512xbf16>, vector<10x512xf32> -> vector<10x512xf32>
    %11 = arith.maximumf %7, %10 : vector<10x512xf32>
    %c3 = arith.constant 3 : index
    %c0_10 = arith.constant 0 : index
    %c0_11 = arith.constant 0 : index
    %12 = vector.load %arg1[%c3, %c0_10, %c0_11] : memref<4x75x512xbf16, #tpu.memory_space<vmem>>, vector<1x75x512xbf16>
    %13 = vector.shape_cast %12 : vector<1x75x512xbf16> to vector<75x512xbf16>
    %cst_12 = arith.constant dense<0.000000e+00> : vector<10x512xf32>
    %14 = tpu.matmul %0, %13, %cst_12 {dimension_numbers = #tpu.dot_dimension_numbers<[1], [0], [0], [1], [0, 0, 1, 1], [], []>} : vector<10x75xbf16>, vector<75x512xbf16>, vector<10x512xf32> -> vector<10x512xf32>
    %15 = arith.maximumf %11, %14 : vector<10x512xf32>
    %c0_13 = arith.constant 0 : index
    %c0_14 = arith.constant 0 : index
    %16 = vector.load %arg3[%c0_13, %c0_14] : memref<10x1xf32, #tpu.memory_space<vmem>>, vector<10x1xf32>
    %17 = vector.broadcast %16 : vector<10x1xf32> to vector<10x512xf32>
    %18 = arith.addf %15, %17 : vector<10x512xf32>
    %cst_15 = arith.constant 0.000000e+00 : f32
    %19 = vector.broadcast %cst_15 : f32 to vector<10x512xf32>
    %20 = arith.maximumf %18, %19 : vector<10x512xf32>
    %21 = arith.truncf %20 : vector<10x512xf32> to vector<10x512xbf16>
    %c0_16 = arith.constant 0 : index
    %c0_17 = arith.constant 0 : index
    %22 = vector.load %arg4[%c0_16, %c0_17] : memref<10x512xbf16, #tpu.memory_space<vmem>>, vector<10x512xbf16>
    tpu.vector_store %arg4[%c0_16, %c0_17], %21 {strides = array<i32>} : memref<10x512xbf16, #tpu.memory_space<vmem>>, vector<10x512xbf16>,
    return
  }
  func.func @transform_0(%arg0: i32) -> (i32, i32, i32) {
    %c0_i32 = arith.constant 0 : i32
    %c0_i32_0 = arith.constant 0 : i32
    %c0_i32_1 = arith.constant 0 : i32
    return %c0_i32, %c0_i32_0, %arg0 : i32, i32, i32
  }
  func.func @transform_1(%arg0: i32) -> (i32, i32) {
    %c0_i32 = arith.constant 0 : i32
    %c0_i32_0 = arith.constant 0 : i32
    %c0_i32_1 = arith.constant 0 : i32
    return %c0_i32, %c0_i32_0 : i32, i32
  }
  func.func @transform_2(%arg0: i32) -> (i32, i32) {
    %c0_i32 = arith.constant 0 : i32
    %c0_i32_0 = arith.constant 0 : i32
    %c0_i32_1 = arith.constant 0 : i32
    return %c0_i32, %c0_i32_0 : i32, i32
  }
  func.func @transform_3(%arg0: i32) -> (i32, i32) {
    %c0_i32 = arith.constant 0 : i32
    %c0_i32_0 = arith.constant 0 : i32
    return %c0_i32, %arg0 : i32, i32
  }
}

</mosaic_0001>

<bundles_post_ra>
// kernel: tpu_custom_call.1
= control target key start
LH: loop header
LB: loop body
LE: loop exit
PB: predicated region body
PF: predicated region fallthrough
CT: control target
= control target key end

     0   :  { %s4112_s0 = inlined_call_operand.vmem [shape: bf16[4,75,1800], index: 0, kind: input, shape index: {}]   ;;  %s4113_s1 = inlined_call_operand.vmem [shape: bf16[10,75], index: 1, kind: input, shape index: {}]   ;;  %s4114_s2 = inlined_call_operand.vmem [shape: f32[10,1], index: 2, kind: input, shape index: {}]   ;;  %s4115_s3 = inlined_call_operand.hbm [shape: bf16[10,1800], index: 3, kind: output, shape index: {}]  }
   0x1   :  { %4116 = sst [smem:[#allocation6_spill]] %s4112_s0 }
   0x2   :  { %8 = vsyncpa [#allocation4], 0 }
   0x3   :  { %10 = vsyncpa [#allocation4 + $0x1], 0  ;;  %s2812_s12 = smov 0   ;;  %s2814_s13 = smov 0  }
   0x4   :  { %s2816_s14 = smov 0   ;;  %s2818_s15 = smov 0  }
   0x5 LB: > { %s2833_s16 = sadd.s32 4294967295, %s2719_s15   ;;  %s2092_s17 = sadd.s32 4294967294, %s2719_s15   ;;  %s2719_s15 = sphi %s2818_s15, %s4143_s15   ;;  %s2715_s14 = sphi %s2816_s14, %s4142_s14   ;;  %s2711_s13 = sphi %s2814_s13, %s4141_s13   ;;  %s2707_s12 = sphi %s2812_s12, %s4140_s12  }
   0x6   : > { %s2837_s18 = sadd.s32 1, %s2719_s15   ;;  %s23_s19 = sadd.s32 1, %s2715_s14 }
   0x7   : > { %s20_s20 = ssub.s32 %s2719_s15, %s2837_s18  ;;  %p30_p0 = scmp.ne.s32.totalorder %s2715_s14, %s2711_s13 }
   0x8   : > { %p21_p1 = scmp.eq.s32.totalorder %s20_s20, 0  ;;  %p31_p2 = scmp.eq.s32.totalorder %s2719_s15, 0 }
   0x9   : > { %p102_p3 = scmp.eq.s32.totalorder %s2833_s16, 3  ;;  %p107_p4 = scmp.ne.s32.totalorder %s2711_s13, %s2707_s12 }
   0xa   : > { %s2849_s21 = scalar_select %p21_p1, %s2715_s14, %s23_s19  }
   0xb   : > { %p32_p5 = por %p31_p2, %p30_p0  ;;  %p2851_p6 = por %p102_p3, %p30_p0 }
   0xc   : > { %p108_p7 = scmp.eq.s32.totalorder %s2092_s17, 3  ;;  %p2094_p9 = scmp.ge.s32.totalorder %s2719_s15, 4 }
   0xe   : > { %p2855_p8 = por %p108_p7, %p107_p4  ;;  %130 = sbr.rel (%p2094_p9) target bundleno = 289 (0x121), region = 24 }
  0x13   : > { %133 = sbr.rel (!%p32_p5) target bundleno = 289 (0x121), region = 28  ;;  %s135_s24 = sand.u32 (%p32_p5), 1, %s2715_s14  }
  0x14   : > { %s2095_s25 = sshll.u32 (%p32_p5), %s2719_s15, 2  ;;  %s2299_s26 = smul.u32 (%p32_p5), 640, %s135_s24 }
  0x15   : > { %s139_s27 = ssub.s32 (%p32_p5), 15, %s2095_s25  ;;  %s2287_s28 = sshll.u32 (%p32_p5), %s2719_s15, 4 }
  0x16   : > { %p140_p10 = scmp.lt.s32.totalorder (%p32_p5), %s139_s27, 4  ;;  %s4119_s0 = sld [smem:[#allocation6_spill]] (%p32_p5) }
  0x17   : > { %s2870_s7 = scalar_lea.vmem (%p32_p5), [#allocation2], %s2299_s26  }
  0x18   : > { %s4145_s27 = smov (!%p140_p10, %s139_s27), 4 }
  0x19   : > { %s142_s5 = smul.u32 2560, %s4145_s27  ;;  %s2868_s6 = sshll.u32 %s4145_s27, 2 }
  0x1b   : > { %p2099_p11 = scmp.eq.s32.totalorder %s142_s5, 0 }
  0x1c   : > { %s2866_s4 = scalar_lea.vmem %s4119_s0, %s2287_s28   ;;  %p150_p12 = scmp.lt.u32.totalorder (!%p2099_p11), %s2868_s6, 8 }
  0x1d   : > { %149 = sbr.rel (%p2099_p11) target bundleno = 289 (0x121), region = 32 }
  0x22   : > { %153 = sbr.rel (%p150_p12) target bundleno = 242 (0xf2), region = 36  ;;  %s2874_s8 = sand.u32 (!%p150_p12), 7, %s2868_s6  }
  0x23   : > { %p248_p13 = scmp.eq.s32.totalorder (!%p150_p12), %s2874_s8, 0  ;;  %p2100_p0 = scmp.ne.s32.totalorder (!%p150_p12), %s2874_s8, 0 }
  0x27   : > { %251 = sbr.rel (%p2100_p0) target bundleno = 119 (0x77), region = 51  ;;  %s252_s9 = sshrl.u32 (!%p2100_p0), %s2868_s6, 3 }
  0x28   : > { %s2881_s10 = sshrl.u32 (!%p2100_p0), %s252_s9, 1 }
  0x29   : > { %p2101_p1 = scmp.le.s32.totalorder (!%p2100_p0), %s2881_s10, 0 }
  0x2c   : > { %2020 = sbr.rel (%p2101_p1) target bundleno = 90 (0x5a), region = 153  ;;  %s4120_s11 = smov (!%p2101_p1), %s2870_s7 }
  0x2d   : > { %s4121_s17 = smov (!%p2101_p1), %s2866_s4  ;;  %s2890_s19 = smov (!%p2101_p1), 0  }
  0x2e   : > { %s2892_s20 = smov (!%p2101_p1), 0  }
  0x31 LB: >> { %v265_v0 = vld [vmem:[%s2727_s17] sm:$0xff]  ;;  %v267_v1 = vld [vmem:[%s2727_s17 + $0x8] sm:$0xff]  ;;  %s425_s24 = sadd.s32 1, %s2731_s19  ;;  %v273_v4 = vld [vmem:[%s2727_s17 + $0x78] sm:$0xff]  ;;  %s259_s20 = sadd.s32 1, %s2735_s20   ;;  %s2735_s20 = sphi %s2892_s20, %s259_s20   ;;  %s2731_s19 = sphi %s2890_s19, %s4124_s19   ;;  %s2727_s17 = sphi %s4121_s17, %s4123_s17   ;;  %s2723_s11 = sphi %s4120_s11, %s4122_s11  }
  0x32   : >> { %v269_v2 = vld [vmem:[%s2727_s17 + $0x3c] sm:$0xff]  ;;  %266 = vst [vmem:[%s2723_s11] sm:$0xff] %v265_v0  ;;  %268 = vst [vmem:[%s2723_s11 + $0x8] sm:$0xff] %v267_v1  ;;  %v271_v3 = vld [vmem:[%s2727_s17 + $0x44] sm:$0xff]  ;;  %p426_p2 = scmp.ge.s32.totalorder %s425_s24, %s2881_s10  ;;  %p258_p3 = scmp.ge.s32.totalorder %s259_s20, %s2881_s10 }
  0x33   : >> { %270 = vst [vmem:[%s2723_s11 + $0x10] sm:$0xff] %v269_v2  ;;  %v275_v5 = vld [vmem:[%s2727_s17 + $0x80] sm:$0xff]  ;;  %272 = vst [vmem:[%s2723_s11 + $0x18] sm:$0xff] %v271_v3  ;;  %v277_v6 = vld [vmem:[%s2727_s17 + $0xb4] sm:$0xff] }
  0x34   : >> { %274 = vst [vmem:[%s2723_s11 + $0x20] sm:$0xff] %v273_v4  ;;  %276 = vst [vmem:[%s2723_s11 + $0x28] sm:$0xff] %v275_v5  ;;  %v279_v7 = vld [vmem:[%s2727_s17 + $0xbc] sm:$0xff]  ;;  %v281_v8 = vld [vmem:[%s2727_s17 + $0xf0] sm:$0xff]  ;;  %s4147_s24 = smov (%p426_p2, %s425_s24), 0 }
  0x35   : >> { %278 = vst [vmem:[%s2723_s11 + $0x30] sm:$0xff] %v277_v6  ;;  %280 = vst [vmem:[%s2723_s11 + $0x38] sm:$0xff] %v279_v7  ;;  %v283_v9 = vld [vmem:[%s2727_s17 + $0xf8] sm:$0xff]  ;;  %v285_v10 = vld [vmem:[%s2727_s17 + $0x12c] sm:$0xff]  ;;  %s2102_s25 = sshll.u32 %s4147_s24, 4  ;;  %s4124_s19 = smov %s4147_s24 }
  0x36   : >> { %282 = vst [vmem:[%s2723_s11 + $0x40] sm:$0xff] %v281_v8  ;;  %v287_v11 = vld [vmem:[%s2727_s17 + $0x134] sm:$0xff]  ;;  %284 = vst [vmem:[%s2723_s11 + $0x48] sm:$0xff] %v283_v9  ;;  %v289_v12 = vld [vmem:[%s2727_s17 + $0x168] sm:$0xff]  ;;  %s2948_s26 = scalar_lea.vmem %s2866_s4, %s2102_s25   ;;  %s2951_s27 = scalar_lea.vmem %s2870_s7, %s2102_s25 [#allocation2]  }
  0x37   : >> { %286 = vst [vmem:[%s2723_s11 + $0x50] sm:$0xff] %v285_v10  ;;  %288 = vst [vmem:[%s2723_s11 + $0x58] sm:$0xff] %v287_v11  ;;  %v291_v13 = vld [vmem:[%s2727_s17 + $0x170] sm:$0xff]  ;;  %v293_v14 = vld [vmem:[%s2727_s17 + $0x1a4] sm:$0xff] }
  0x38   : >> { %290 = vst [vmem:[%s2723_s11 + $0x60] sm:$0xff] %v289_v12  ;;  %292 = vst [vmem:[%s2723_s11 + $0x68] sm:$0xff] %v291_v13  ;;  %v295_v15 = vld [vmem:[%s2727_s17 + $0x1ac] sm:$0xff]  ;;  %v297_v16 = vld [vmem:[%s2727_s17 + $0x1e0] sm:$0xff] }
  0x39   : >> { %294 = vst [vmem:[%s2723_s11 + $0x70] sm:$0xff] %v293_v14  ;;  %v299_v17 = vld [vmem:[%s2727_s17 + $0x1e8] sm:$0xff]  ;;  %296 = vst [vmem:[%s2723_s11 + $0x78] sm:$0xff] %v295_v15  ;;  %v301_v18 = vld [vmem:[%s2727_s17 + $0x21c] sm:$0xff] }
  0x3a   : >> { %298 = vst [vmem:[%s2723_s11 + $0x80] sm:$0xff] %v297_v16  ;;  %300 = vst [vmem:[%s2723_s11 + $0x88] sm:$0xff] %v299_v17  ;;  %v303_v19 = vld [vmem:[%s2727_s17 + $0x224] sm:$0xff]  ;;  %v305_v20 = vld [vmem:[%s2727_s17 + $0x258] sm:$0xff] }
  0x3b   : >> { %302 = vst [vmem:[%s2723_s11 + $0x90] sm:$0xff] %v301_v18  ;;  %304 = vst [vmem:[%s2723_s11 + $0x98] sm:$0xff] %v303_v19  ;;  %v307_v21 = vld [vmem:[%s2727_s17 + $0x260] sm:$0xff]  ;;  %v309_v22 = vld [vmem:[%s2727_s17 + $0x294] sm:$0xff] }
  0x3c   : >> { %306 = vst [vmem:[%s2723_s11 + $0xa0] sm:$0xff] %v305_v20  ;;  %v311_v23 = vld [vmem:[%s2727_s17 + $0x29c] sm:$0xff]  ;;  %308 = vst [vmem:[%s2723_s11 + $0xa8] sm:$0xff] %v307_v21  ;;  %v313_v24 = vld [vmem:[%s2727_s17 + $0x2d0] sm:$0xff] }
  0x3d   : >> { %310 = vst [vmem:[%s2723_s11 + $0xb0] sm:$0xff] %v309_v22  ;;  %312 = vst [vmem:[%s2723_s11 + $0xb8] sm:$0xff] %v311_v23  ;;  %v315_v25 = vld [vmem:[%s2727_s17 + $0x2d8] sm:$0xff]  ;;  %v317_v26 = vld [vmem:[%s2727_s17 + $0x30c] sm:$0xff] }
  0x3e   : >> { %314 = vst [vmem:[%s2723_s11 + $0xc0] sm:$0xff] %v313_v24  ;;  %316 = vst [vmem:[%s2723_s11 + $0xc8] sm:$0xff] %v315_v25  ;;  %v319_v27 = vld [vmem:[%s2727_s17 + $0x314] sm:$0xff]  ;;  %v321_v28 = vld [vmem:[%s2727_s17 + $0x348] sm:$0xff] }
  0x3f   : >> { %318 = vst [vmem:[%s2723_s11 + $0xd0] sm:$0xff] %v317_v26  ;;  %v323_v29 = vld [vmem:[%s2727_s17 + $0x350] sm:$0xff]  ;;  %320 = vst [vmem:[%s2723_s11 + $0xd8] sm:$0xff] %v319_v27  ;;  %v325_v30 = vld [vmem:[%s2727_s17 + $0x384] sm:$0xff] }
  0x40   : >> { %322 = vst [vmem:[%s2723_s11 + $0xe0] sm:$0xff] %v321_v28  ;;  %324 = vst [vmem:[%s2723_s11 + $0xe8] sm:$0xff] %v323_v29  ;;  %v327_v31 = vld [vmem:[%s2727_s17 + $0x38c] sm:$0xff]  ;;  %v329_v32 = vld [vmem:[%s2727_s17 + $0x3c0] sm:$0xff] }
  0x41   : >> { %326 = vst [vmem:[%s2723_s11 + $0xf0] sm:$0xff] %v325_v30  ;;  %328 = vst [vmem:[%s2723_s11 + $0xf8] sm:$0xff] %v327_v31  ;;  %v331_v33 = vld [vmem:[%s2727_s17 + $0x3c8] sm:$0xff]  ;;  %v333_v34 = vld [vmem:[%s2727_s17 + $0x3fc] sm:$0xff] }
  0x42   : >> { %330 = vst [vmem:[%s2723_s11 + $0x100] sm:$0xff] %v329_v32  ;;  %v335_v35 = vld [vmem:[%s2727_s17 + $0x404] sm:$0xff]  ;;  %332 = vst [vmem:[%s2723_s11 + $0x108] sm:$0xff] %v331_v33  ;;  %v337_v36 = vld [vmem:[%s2727_s17 + $0x438] sm:$0xff] }
  0x43   : >> { %334 = vst [vmem:[%s2723_s11 + $0x110] sm:$0xff] %v333_v34  ;;  %336 = vst [vmem:[%s2723_s11 + $0x118] sm:$0xff] %v335_v35  ;;  %v339_v37 = vld [vmem:[%s2727_s17 + $0x440] sm:$0xff]  ;;  %v341_v38 = vld [vmem:[%s2727_s17 + $0x474] sm:$0xff] }
  0x44   : >> { %338 = vst [vmem:[%s2723_s11 + $0x120] sm:$0xff] %v337_v36  ;;  %340 = vst [vmem:[%s2723_s11 + $0x128] sm:$0xff] %v339_v37  ;;  %v343_v39 = vld [vmem:[%s2727_s17 + $0x47c] sm:$0xff]  ;;  %v345_v40 = vld [vmem:[%s2727_s17 + $0x4b0] sm:$0xff] }
  0x45   : >> { %342 = vst [vmem:[%s2723_s11 + $0x130] sm:$0xff] %v341_v38  ;;  %v347_v41 = vld [vmem:[%s2727_s17 + $0x4b8] sm:$0xff]  ;;  %344 = vst [vmem:[%s2723_s11 + $0x138] sm:$0xff] %v343_v39  ;;  %v349_v42 = vld [vmem:[%s2727_s17 + $0x4ec] sm:$0xff] }
  0x46   : >> { %346 = vst [vmem:[%s2723_s11 + $0x140] sm:$0xff] %v345_v40  ;;  %348 = vst [vmem:[%s2723_s11 + $0x148] sm:$0xff] %v347_v41  ;;  %v351_v43 = vld [vmem:[%s2727_s17 + $0x4f4] sm:$0xff]  ;;  %v353_v44 = vld [vmem:[%s2727_s17 + $0x528] sm:$0xff] }
  0x47   : >> { %350 = vst [vmem:[%s2723_s11 + $0x150] sm:$0xff] %v349_v42  ;;  %352 = vst [vmem:[%s2723_s11 + $0x158] sm:$0xff] %v351_v43  ;;  %v355_v45 = vld [vmem:[%s2727_s17 + $0x530] sm:$0xff]  ;;  %v357_v46 = vld [vmem:[%s2727_s17 + $0x564] sm:$0xff] }
  0x48   : >> { %354 = vst [vmem:[%s2723_s11 + $0x160] sm:$0xff] %v353_v44  ;;  %v359_v47 = vld [vmem:[%s2727_s17 + $0x56c] sm:$0xff]  ;;  %356 = vst [vmem:[%s2723_s11 + $0x168] sm:$0xff] %v355_v45  ;;  %v361_v48 = vld [vmem:[%s2727_s17 + $0x5a0] sm:$0xff] }
  0x49   : >> { %358 = vst [vmem:[%s2723_s11 + $0x170] sm:$0xff] %v357_v46  ;;  %360 = vst [vmem:[%s2723_s11 + $0x178] sm:$0xff] %v359_v47  ;;  %v363_v49 = vld [vmem:[%s2727_s17 + $0x5a8] sm:$0xff]  ;;  %v365_v50 = vld [vmem:[%s2727_s17 + $0x5dc] sm:$0xff] }
  0x4a   : >> { %362 = vst [vmem:[%s2723_s11 + $0x180] sm:$0xff] %v361_v48  ;;  %364 = vst [vmem:[%s2723_s11 + $0x188] sm:$0xff] %v363_v49  ;;  %v367_v51 = vld [vmem:[%s2727_s17 + $0x5e4] sm:$0xff]  ;;  %v369_v52 = vld [vmem:[%s2727_s17 + $0x618] sm:$0xff] }
  0x4b   : >> { %366 = vst [vmem:[%s2723_s11 + $0x190] sm:$0xff] %v365_v50  ;;  %v371_v53 = vld [vmem:[%s2727_s17 + $0x620] sm:$0xff]  ;;  %368 = vst [vmem:[%s2723_s11 + $0x198] sm:$0xff] %v367_v51  ;;  %v373_v54 = vld [vmem:[%s2727_s17 + $0x654] sm:$0xff] }
  0x4c   : >> { %370 = vst [vmem:[%s2723_s11 + $0x1a0] sm:$0xff] %v369_v52  ;;  %372 = vst [vmem:[%s2723_s11 + $0x1a8] sm:$0xff] %v371_v53  ;;  %v375_v55 = vld [vmem:[%s2727_s17 + $0x65c] sm:$0xff]  ;;  %v377_v56 = vld [vmem:[%s2727_s17 + $0x690] sm:$0xff] }
  0x4d   : >> { %374 = vst [vmem:[%s2723_s11 + $0x1b0] sm:$0xff] %v373_v54  ;;  %376 = vst [vmem:[%s2723_s11 + $0x1b8] sm:$0xff] %v375_v55  ;;  %v379_v57 = vld [vmem:[%s2727_s17 + $0x698] sm:$0xff]  ;;  %v381_v58 = vld [vmem:[%s2727_s17 + $0x6cc] sm:$0xff] }
  0x4e   : >> { %378 = vst [vmem:[%s2723_s11 + $0x1c0] sm:$0xff] %v377_v56  ;;  %v383_v59 = vld [vmem:[%s2727_s17 + $0x6d4] sm:$0xff]  ;;  %380 = vst [vmem:[%s2723_s11 + $0x1c8] sm:$0xff] %v379_v57  ;;  %v385_v60 = vld [vmem:[%s2727_s17 + $0x708] sm:$0xff] }
  0x4f   : >> { %382 = vst [vmem:[%s2723_s11 + $0x1d0] sm:$0xff] %v381_v58  ;;  %384 = vst [vmem:[%s2723_s11 + $0x1d8] sm:$0xff] %v383_v59  ;;  %v387_v61 = vld [vmem:[%s2727_s17 + $0x710] sm:$0xff]  ;;  %v389_v62 = vld [vmem:[%s2727_s17 + $0x744] sm:$0xff] }
  0x50   : >> { %386 = vst [vmem:[%s2723_s11 + $0x1e0] sm:$0xff] %v385_v60  ;;  %388 = vst [vmem:[%s2723_s11 + $0x1e8] sm:$0xff] %v387_v61  ;;  %v391_v63 = vld [vmem:[%s2727_s17 + $0x74c] sm:$0xff]  ;;  %v393_v0 = vld [vmem:[%s2727_s17 + $0x780] sm:$0xff] }
  0x51   : >> { %390 = vst [vmem:[%s2723_s11 + $0x1f0] sm:$0xff] %v389_v62  ;;  %v395_v1 = vld [vmem:[%s2727_s17 + $0x788] sm:$0xff]  ;;  %392 = vst [vmem:[%s2723_s11 + $0x1f8] sm:$0xff] %v391_v63  ;;  %v397_v2 = vld [vmem:[%s2727_s17 + $0x7bc] sm:$0xff] }
  0x52   : >> { %394 = vst [vmem:[%s2723_s11 + $0x200] sm:$0xff] %v393_v0  ;;  %396 = vst [vmem:[%s2723_s11 + $0x208] sm:$0xff] %v395_v1  ;;  %v399_v3 = vld [vmem:[%s2727_s17 + $0x7c4] sm:$0xff]  ;;  %v401_v4 = vld [vmem:[%s2727_s17 + $0x7f8] sm:$0xff] }
  0x53   : >> { %398 = vst [vmem:[%s2723_s11 + $0x210] sm:$0xff] %v397_v2  ;;  %400 = vst [vmem:[%s2723_s11 + $0x218] sm:$0xff] %v399_v3  ;;  %v403_v5 = vld [vmem:[%s2727_s17 + $0x800] sm:$0xff]  ;;  %v405_v6 = vld [vmem:[%s2727_s17 + $0x834] sm:$0xff] }
  0x54   : >> { %402 = vst [vmem:[%s2723_s11 + $0x220] sm:$0xff] %v401_v4  ;;  %v407_v7 = vld [vmem:[%s2727_s17 + $0x83c] sm:$0xff]  ;;  %404 = vst [vmem:[%s2723_s11 + $0x228] sm:$0xff] %v403_v5  ;;  %v409_v8 = vld [vmem:[%s2727_s17 + $0x870] sm:$0xff] }
  0x55   : >> { %406 = vst [vmem:[%s2723_s11 + $0x230] sm:$0xff] %v405_v6  ;;  %408 = vst [vmem:[%s2723_s11 + $0x238] sm:$0xff] %v407_v7  ;;  %v411_v9 = vld [vmem:[%s2727_s17 + $0x878] sm:$0xff]  ;;  %v413_v10 = vld [vmem:[%s2727_s17 + $0x8ac] sm:$0xff]  ;;  %261 = sbr.rel (!%p258_p3) target bundleno = 49 (0x31), region = 159 }
  0x56   : >> { %410 = vst [vmem:[%s2723_s11 + $0x240] sm:$0xff] %v409_v8  ;;  %412 = vst [vmem:[%s2723_s11 + $0x248] sm:$0xff] %v411_v9  ;;  %v415_v11 = vld [vmem:[%s2727_s17 + $0x8b4] sm:$0xff]  ;;  %v417_v12 = vld [vmem:[%s2727_s17 + $0x8e8] sm:$0xff] }
  0x57   : >> { %414 = vst [vmem:[%s2723_s11 + $0x250] sm:$0xff] %v413_v10  ;;  %v419_v13 = vld [vmem:[%s2727_s17 + $0x8f0] sm:$0xff]  ;;  %416 = vst [vmem:[%s2723_s11 + $0x258] sm:$0xff] %v415_v11  ;;  %v421_v14 = vld [vmem:[%s2727_s17 + $0x924] sm:$0xff] }
  0x58   : >> { %418 = vst [vmem:[%s2723_s11 + $0x260] sm:$0xff] %v417_v12  ;;  %420 = vst [vmem:[%s2723_s11 + $0x268] sm:$0xff] %v419_v13  ;;  %v423_v15 = vld [vmem:[%s2727_s17 + $0x92c] sm:$0xff]  ;;  %s4123_s17 = smov %s2948_s26 }
  0x59   : >> { %422 = vst [vmem:[%s2723_s11 + $0x270] sm:$0xff] %v421_v14  ;;  %424 = vst [vmem:[%s2723_s11 + $0x278] sm:$0xff] %v423_v15  ;;  %s4122_s11 = smov %s2951_s27 }
  0x5a PF: > { %s3089_s28 = sand.u32 1, %s252_s9   ;;  %s2288_s29 = sshll.u32 %s2881_s10, 8 }
  0x5b   : > { %s436_s30 = sshra.s32 %s2288_s29, 4  ;;  %p2107_p4 = scmp.le.s32.totalorder %s3089_s28, 0 }
  0x5c   : > { %s3093_s5 = scalar_lea.vmem %s2866_s4, %s436_s30   ;;  %s3096_s25 = scalar_lea.vmem %s2870_s7, %s436_s30 [#allocation2]  }
  0x5d   : > { %2034 = sbr.rel (%p2107_p4) target bundleno = 119 (0x77), region = 164  ;;  %s4125_s11 = smov (!%p2107_p4), %s3096_s25 }
  0x5e   : > { %s4126_s17 = smov (!%p2107_p4), %s3093_s5  ;;  %s3105_s19 = smov (!%p2107_p4), 0  }
  0x5f   : > { %s3107_s20 = smov (!%p2107_p4), 0  }
  0x62 LB: >> { %v452_v16 = vld [vmem:[%s2743_s17] sm:$0xff]  ;;  %v456_v18 = vld [vmem:[%s2743_s17 + $0x78] sm:$0xff]  ;;  %s532_s9 = sadd.s32 1, %s2747_s19  ;;  %v460_v20 = vld [vmem:[%s2743_s17 + $0xf0] sm:$0xff]  ;;  %s446_s20 = sadd.s32 1, %s2751_s20   ;;  %s2751_s20 = sphi %s3107_s20, %s446_s20   ;;  %s2747_s19 = sphi %s3105_s19, %s4129_s19   ;;  %s2743_s17 = sphi %s4126_s17, %s4128_s17   ;;  %s2739_s11 = sphi %s4125_s11, %s4127_s11  }
  0x63   : >> { %v454_v17 = vld [vmem:[%s2743_s17 + $0x3c] sm:$0xff]  ;;  %453 = vst [vmem:[%s2739_s11] sm:$0xff] %v452_v16  ;;  %457 = vst [vmem:[%s2739_s11 + $0x20] sm:$0xff] %v456_v18  ;;  %v458_v19 = vld [vmem:[%s2743_s17 + $0xb4] sm:$0xff]  ;;  %p533_p5 = scmp.ge.s32.totalorder %s532_s9, %s3089_s28  ;;  %p445_p7 = scmp.ge.s32.totalorder %s446_s20, %s3089_s28 }
  0x64   : >> { %455 = vst [vmem:[%s2739_s11 + $0x10] sm:$0xff] %v454_v17  ;;  %v462_v21 = vld [vmem:[%s2743_s17 + $0x12c] sm:$0xff]  ;;  %459 = vst [vmem:[%s2739_s11 + $0x30] sm:$0xff] %v458_v19  ;;  %v466_v23 = vld [vmem:[%s2743_s17 + $0x1a4] sm:$0xff] }
  0x65   : >> { %461 = vst [vmem:[%s2739_s11 + $0x40] sm:$0xff] %v460_v20  ;;  %463 = vst [vmem:[%s2739_s11 + $0x50] sm:$0xff] %v462_v21  ;;  %v464_v22 = vld [vmem:[%s2743_s17 + $0x168] sm:$0xff]  ;;  %v468_v24 = vld [vmem:[%s2743_s17 + $0x1e0] sm:$0xff]  ;;  %s4149_s9 = smov (%p533_p5, %s532_s9), 0 }
  0x66   : >> { %465 = vst [vmem:[%s2739_s11 + $0x60] sm:$0xff] %v464_v22  ;;  %467 = vst [vmem:[%s2739_s11 + $0x70] sm:$0xff] %v466_v23  ;;  %v470_v25 = vld [vmem:[%s2743_s17 + $0x21c] sm:$0xff]  ;;  %v474_v27 = vld [vmem:[%s2743_s17 + $0x294] sm:$0xff]  ;;  %s2108_s10 = sshll.u32 %s4149_s9, 3  ;;  %s4129_s19 = smov %s4149_s9 }
  0x67   : >> { %469 = vst [vmem:[%s2739_s11 + $0x80] sm:$0xff] %v468_v24  ;;  %v472_v26 = vld [vmem:[%s2743_s17 + $0x258] sm:$0xff]  ;;  %471 = vst [vmem:[%s2739_s11 + $0x90] sm:$0xff] %v470_v25  ;;  %v476_v28 = vld [vmem:[%s2743_s17 + $0x2d0] sm:$0xff]  ;;  %s3163_s24 = scalar_lea.vmem %s3093_s5, %s2108_s10   ;;  %s3166_s26 = scalar_lea.vmem %s3096_s25, %s2108_s10 [#allocation2]  }
  0x68   : >> { %473 = vst [vmem:[%s2739_s11 + $0xa0] sm:$0xff] %v472_v26  ;;  %475 = vst [vmem:[%s2739_s11 + $0xb0] sm:$0xff] %v474_v27  ;;  %v478_v29 = vld [vmem:[%s2743_s17 + $0x30c] sm:$0xff]  ;;  %v482_v31 = vld [vmem:[%s2743_s17 + $0x384] sm:$0xff] }
  0x69   : >> { %v480_v30 = vld [vmem:[%s2743_s17 + $0x348] sm:$0xff]  ;;  %477 = vst [vmem:[%s2739_s11 + $0xc0] sm:$0xff] %v476_v28  ;;  %479 = vst [vmem:[%s2739_s11 + $0xd0] sm:$0xff] %v478_v29  ;;  %v484_v32 = vld [vmem:[%s2743_s17 + $0x3c0] sm:$0xff] }
  0x6a   : >> { %481 = vst [vmem:[%s2739_s11 + $0xe0] sm:$0xff] %v480_v30  ;;  %v486_v33 = vld [vmem:[%s2743_s17 + $0x3fc] sm:$0xff]  ;;  %483 = vst [vmem:[%s2739_s11 + $0xf0] sm:$0xff] %v482_v31  ;;  %v490_v35 = vld [vmem:[%s2743_s17 + $0x474] sm:$0xff] }
  0x6b   : >> { %485 = vst [vmem:[%s2739_s11 + $0x100] sm:$0xff] %v484_v32  ;;  %487 = vst [vmem:[%s2739_s11 + $0x110] sm:$0xff] %v486_v33  ;;  %v488_v34 = vld [vmem:[%s2743_s17 + $0x438] sm:$0xff]  ;;  %v492_v36 = vld [vmem:[%s2743_s17 + $0x4b0] sm:$0xff] }
  0x6c   : >> { %489 = vst [vmem:[%s2739_s11 + $0x120] sm:$0xff] %v488_v34  ;;  %491 = vst [vmem:[%s2739_s11 + $0x130] sm:$0xff] %v490_v35  ;;  %v494_v37 = vld [vmem:[%s2743_s17 + $0x4ec] sm:$0xff]  ;;  %v498_v39 = vld [vmem:[%s2743_s17 + $0x564] sm:$0xff] }
  0x6d   : >> { %493 = vst [vmem:[%s2739_s11 + $0x140] sm:$0xff] %v492_v36  ;;  %v496_v38 = vld [vmem:[%s2743_s17 + $0x528] sm:$0xff]  ;;  %495 = vst [vmem:[%s2739_s11 + $0x150] sm:$0xff] %v494_v37  ;;  %v500_v40 = vld [vmem:[%s2743_s17 + $0x5a0] sm:$0xff] }
  0x6e   : >> { %497 = vst [vmem:[%s2739_s11 + $0x160] sm:$0xff] %v496_v38  ;;  %499 = vst [vmem:[%s2739_s11 + $0x170] sm:$0xff] %v498_v39  ;;  %v502_v41 = vld [vmem:[%s2743_s17 + $0x5dc] sm:$0xff]  ;;  %v506_v43 = vld [vmem:[%s2743_s17 + $0x654] sm:$0xff] }
  0x6f   : >> { %v504_v42 = vld [vmem:[%s2743_s17 + $0x618] sm:$0xff]  ;;  %501 = vst [vmem:[%s2739_s11 + $0x180] sm:$0xff] %v500_v40  ;;  %503 = vst [vmem:[%s2739_s11 + $0x190] sm:$0xff] %v502_v41  ;;  %v508_v44 = vld [vmem:[%s2743_s17 + $0x690] sm:$0xff] }
  0x70   : >> { %505 = vst [vmem:[%s2739_s11 + $0x1a0] sm:$0xff] %v504_v42  ;;  %v510_v45 = vld [vmem:[%s2743_s17 + $0x6cc] sm:$0xff]  ;;  %507 = vst [vmem:[%s2739_s11 + $0x1b0] sm:$0xff] %v506_v43  ;;  %v514_v47 = vld [vmem:[%s2743_s17 + $0x744] sm:$0xff] }
  0x71   : >> { %509 = vst [vmem:[%s2739_s11 + $0x1c0] sm:$0xff] %v508_v44  ;;  %511 = vst [vmem:[%s2739_s11 + $0x1d0] sm:$0xff] %v510_v45  ;;  %v512_v46 = vld [vmem:[%s2743_s17 + $0x708] sm:$0xff]  ;;  %v516_v48 = vld [vmem:[%s2743_s17 + $0x780] sm:$0xff] }
  0x72   : >> { %513 = vst [vmem:[%s2739_s11 + $0x1e0] sm:$0xff] %v512_v46  ;;  %515 = vst [vmem:[%s2739_s11 + $0x1f0] sm:$0xff] %v514_v47  ;;  %v518_v49 = vld [vmem:[%s2743_s17 + $0x7bc] sm:$0xff]  ;;  %v522_v51 = vld [vmem:[%s2743_s17 + $0x834] sm:$0xff]  ;;  %448 = sbr.rel (!%p445_p7) target bundleno = 98 (0x62), region = 170 }
  0x73   : >> { %517 = vst [vmem:[%s2739_s11 + $0x200] sm:$0xff] %v516_v48  ;;  %v520_v50 = vld [vmem:[%s2743_s17 + $0x7f8] sm:$0xff]  ;;  %519 = vst [vmem:[%s2739_s11 + $0x210] sm:$0xff] %v518_v49  ;;  %v524_v52 = vld [vmem:[%s2743_s17 + $0x870] sm:$0xff] }
  0x74   : >> { %521 = vst [vmem:[%s2739_s11 + $0x220] sm:$0xff] %v520_v50  ;;  %523 = vst [vmem:[%s2739_s11 + $0x230] sm:$0xff] %v522_v51  ;;  %v526_v53 = vld [vmem:[%s2743_s17 + $0x8ac] sm:$0xff]  ;;  %v530_v55 = vld [vmem:[%s2743_s17 + $0x924] sm:$0xff] }
  0x75   : >> { %v528_v54 = vld [vmem:[%s2743_s17 + $0x8e8] sm:$0xff]  ;;  %525 = vst [vmem:[%s2739_s11 + $0x240] sm:$0xff] %v524_v52  ;;  %527 = vst [vmem:[%s2739_s11 + $0x250] sm:$0xff] %v526_v53  ;;  %s4128_s17 = smov %s3163_s24 }
  0x76   : >> { %529 = vst [vmem:[%s2739_s11 + $0x260] sm:$0xff] %v528_v54  ;;  %531 = vst [vmem:[%s2739_s11 + $0x270] sm:$0xff] %v530_v55  ;;  %s4127_s11 = smov %s3166_s26 }
  0x77 PF: > { %541 = sbr.rel (%p248_p13) target bundleno = 242 (0xf2), region = 69  ;;  %s543_s27 = ssub.s32 (!%p248_p13), %s2868_s6, %s2874_s8 }
  0x78   : > { %s547_s29 = sshrl.u32 (!%p248_p13), %s2868_s6, 3  ;;  %s3228_s30 = scalar_lea.vmem (!%p248_p13), %s2866_s4, %s543_s27 }
  0x79   : > { %s3231_s10 = scalar_lea.vmem (!%p248_p13), %s2870_s7, %s543_s27 [#allocation2]  ;;  %s3235_s20 = sshrl.u32 (!%p248_p13), %s547_s29, 1 }
  0x7a   : > { %p2110_p9 = scmp.le.s32.totalorder (!%p248_p13), %s3235_s20, 0 }
  0x7c   : > { %2048 = sbr.rel (%p2110_p9) target bundleno = 170 (0xaa), region = 175  ;;  %s4130_s28 = smov (!%p2110_p9), %s2870_s7 }
  0x7d   : > { %s4131_s5 = smov (!%p2110_p9), %s2866_s4  ;;  %s3244_s25 = smov (!%p2110_p9), 0  }
  0x7e   : > { %s3246_s11 = smov (!%p2110_p9), 0  }
  0x81 LB: >> { %v560_v56 = vld [vmem:[%s2759_s5] sm:$0xff]  ;;  %v562_v57 = vld [vmem:[%s2759_s5 + $0x8] sm:$0xff]  ;;  %s720_s17 = sadd.s32 1, %s2763_s25  ;;  %v568_v60 = vld [vmem:[%s2759_s5 + $0x78] sm:$0xff]  ;;  %s554_s11 = sadd.s32 1, %s2767_s11   ;;  %s2767_s11 = sphi %s3246_s11, %s554_s11   ;;  %s2763_s25 = sphi %s3244_s25, %s4134_s25   ;;  %s2759_s5 = sphi %s4131_s5, %s4133_s5   ;;  %s2755_s28 = sphi %s4130_s28, %s4132_s28  }
  0x82   : >> { %v564_v58 = vld [vmem:[%s2759_s5 + $0x3c] sm:$0xff]  ;;  %561 = vst [vmem:[%s2755_s28] sm:$0xff] %v560_v56  ;;  %563 = vst [vmem:[%s2755_s28 + $0x8] sm:$0xff] %v562_v57  ;;  %v566_v59 = vld [vmem:[%s2759_s5 + $0x44] sm:$0xff]  ;;  %p721_p10 = scmp.ge.s32.totalorder %s720_s17, %s3235_s20  ;;  %p553_p11 = scmp.ge.s32.totalorder %s554_s11, %s3235_s20 }
  0x83   : >> { %565 = vst [vmem:[%s2755_s28 + $0x10] sm:$0xff] %v564_v58  ;;  %v570_v61 = vld [vmem:[%s2759_s5 + $0x80] sm:$0xff]  ;;  %567 = vst [vmem:[%s2755_s28 + $0x18] sm:$0xff] %v566_v59  ;;  %v572_v62 = vld [vmem:[%s2759_s5 + $0xb4] sm:$0xff] }
  0x84   : >> { %569 = vst [vmem:[%s2755_s28 + $0x20] sm:$0xff] %v568_v60  ;;  %571 = vst [vmem:[%s2755_s28 + $0x28] sm:$0xff] %v570_v61  ;;  %v574_v63 = vld [vmem:[%s2759_s5 + $0xbc] sm:$0xff]  ;;  %v576_v0 = vld [vmem:[%s2759_s5 + $0xf0] sm:$0xff]  ;;  %s4151_s17 = smov (%p721_p10, %s720_s17), 0 }
  0x85   : >> { %573 = vst [vmem:[%s2755_s28 + $0x30] sm:$0xff] %v572_v62  ;;  %575 = vst [vmem:[%s2755_s28 + $0x38] sm:$0xff] %v574_v63  ;;  %v578_v1 = vld [vmem:[%s2759_s5 + $0xf8] sm:$0xff]  ;;  %v580_v2 = vld [vmem:[%s2759_s5 + $0x12c] sm:$0xff]  ;;  %s2111_s19 = sshll.u32 %s4151_s17, 4  ;;  %s4134_s25 = smov %s4151_s17 }
  0x86   : >> { %577 = vst [vmem:[%s2755_s28 + $0x40] sm:$0xff] %v576_v0  ;;  %v582_v3 = vld [vmem:[%s2759_s5 + $0x134] sm:$0xff]  ;;  %579 = vst [vmem:[%s2755_s28 + $0x48] sm:$0xff] %v578_v1  ;;  %v584_v4 = vld [vmem:[%s2759_s5 + $0x168] sm:$0xff]  ;;  %s3302_s9 = scalar_lea.vmem %s2866_s4, %s2111_s19   ;;  %s3305_s24 = scalar_lea.vmem %s2870_s7, %s2111_s19 [#allocation2]  }
  0x87   : >> { %581 = vst [vmem:[%s2755_s28 + $0x50] sm:$0xff] %v580_v2  ;;  %583 = vst [vmem:[%s2755_s28 + $0x58] sm:$0xff] %v582_v3  ;;  %v586_v5 = vld [vmem:[%s2759_s5 + $0x170] sm:$0xff]  ;;  %v588_v6 = vld [vmem:[%s2759_s5 + $0x1a4] sm:$0xff] }
  0x88   : >> { %585 = vst [vmem:[%s2755_s28 + $0x60] sm:$0xff] %v584_v4  ;;  %587 = vst [vmem:[%s2755_s28 + $0x68] sm:$0xff] %v586_v5  ;;  %v590_v7 = vld [vmem:[%s2759_s5 + $0x1ac] sm:$0xff]  ;;  %v592_v8 = vld [vmem:[%s2759_s5 + $0x1e0] sm:$0xff] }
  0x89   : >> { %589 = vst [vmem:[%s2755_s28 + $0x70] sm:$0xff] %v588_v6  ;;  %v594_v9 = vld [vmem:[%s2759_s5 + $0x1e8] sm:$0xff]  ;;  %591 = vst [vmem:[%s2755_s28 + $0x78] sm:$0xff] %v590_v7  ;;  %v596_v10 = vld [vmem:[%s2759_s5 + $0x21c] sm:$0xff] }
  0x8a   : >> { %593 = vst [vmem:[%s2755_s28 + $0x80] sm:$0xff] %v592_v8  ;;  %595 = vst [vmem:[%s2755_s28 + $0x88] sm:$0xff] %v594_v9  ;;  %v598_v11 = vld [vmem:[%s2759_s5 + $0x224] sm:$0xff]  ;;  %v600_v12 = vld [vmem:[%s2759_s5 + $0x258] sm:$0xff] }
  0x8b   : >> { %597 = vst [vmem:[%s2755_s28 + $0x90] sm:$0xff] %v596_v10  ;;  %599 = vst [vmem:[%s2755_s28 + $0x98] sm:$0xff] %v598_v11  ;;  %v602_v13 = vld [vmem:[%s2759_s5 + $0x260] sm:$0xff]  ;;  %v604_v14 = vld [vmem:[%s2759_s5 + $0x294] sm:$0xff] }
  0x8c   : >> { %601 = vst [vmem:[%s2755_s28 + $0xa0] sm:$0xff] %v600_v12  ;;  %v606_v15 = vld [vmem:[%s2759_s5 + $0x29c] sm:$0xff]  ;;  %603 = vst [vmem:[%s2755_s28 + $0xa8] sm:$0xff] %v602_v13  ;;  %v608_v16 = vld [vmem:[%s2759_s5 + $0x2d0] sm:$0xff] }
  0x8d   : >> { %605 = vst [vmem:[%s2755_s28 + $0xb0] sm:$0xff] %v604_v14  ;;  %607 = vst [vmem:[%s2755_s28 + $0xb8] sm:$0xff] %v606_v15  ;;  %v610_v17 = vld [vmem:[%s2759_s5 + $0x2d8] sm:$0xff]  ;;  %v612_v18 = vld [vmem:[%s2759_s5 + $0x30c] sm:$0xff] }
  0x8e   : >> { %609 = vst [vmem:[%s2755_s28 + $0xc0] sm:$0xff] %v608_v16  ;;  %611 = vst [vmem:[%s2755_s28 + $0xc8] sm:$0xff] %v610_v17  ;;  %v614_v19 = vld [vmem:[%s2759_s5 + $0x314] sm:$0xff]  ;;  %v616_v20 = vld [vmem:[%s2759_s5 + $0x348] sm:$0xff] }
  0x8f   : >> { %613 = vst [vmem:[%s2755_s28 + $0xd0] sm:$0xff] %v612_v18  ;;  %v618_v21 = vld [vmem:[%s2759_s5 + $0x350] sm:$0xff]  ;;  %615 = vst [vmem:[%s2755_s28 + $0xd8] sm:$0xff] %v614_v19  ;;  %v620_v22 = vld [vmem:[%s2759_s5 + $0x384] sm:$0xff] }
  0x90   : >> { %617 = vst [vmem:[%s2755_s28 + $0xe0] sm:$0xff] %v616_v20  ;;  %619 = vst [vmem:[%s2755_s28 + $0xe8] sm:$0xff] %v618_v21  ;;  %v622_v23 = vld [vmem:[%s2759_s5 + $0x38c] sm:$0xff]  ;;  %v624_v24 = vld [vmem:[%s2759_s5 + $0x3c0] sm:$0xff] }
  0x91   : >> { %621 = vst [vmem:[%s2755_s28 + $0xf0] sm:$0xff] %v620_v22  ;;  %623 = vst [vmem:[%s2755_s28 + $0xf8] sm:$0xff] %v622_v23  ;;  %v626_v25 = vld [vmem:[%s2759_s5 + $0x3c8] sm:$0xff]  ;;  %v628_v26 = vld [vmem:[%s2759_s5 + $0x3fc] sm:$0xff] }
  0x92   : >> { %625 = vst [vmem:[%s2755_s28 + $0x100] sm:$0xff] %v624_v24  ;;  %v630_v27 = vld [vmem:[%s2759_s5 + $0x404] sm:$0xff]  ;;  %627 = vst [vmem:[%s2755_s28 + $0x108] sm:$0xff] %v626_v25  ;;  %v632_v28 = vld [vmem:[%s2759_s5 + $0x438] sm:$0xff] }
  0x93   : >> { %629 = vst [vmem:[%s2755_s28 + $0x110] sm:$0xff] %v628_v26  ;;  %631 = vst [vmem:[%s2755_s28 + $0x118] sm:$0xff] %v630_v27  ;;  %v634_v29 = vld [vmem:[%s2759_s5 + $0x440] sm:$0xff]  ;;  %v636_v30 = vld [vmem:[%s2759_s5 + $0x474] sm:$0xff] }
  0x94   : >> { %633 = vst [vmem:[%s2755_s28 + $0x120] sm:$0xff] %v632_v28  ;;  %635 = vst [vmem:[%s2755_s28 + $0x128] sm:$0xff] %v634_v29  ;;  %v638_v31 = vld [vmem:[%s2759_s5 + $0x47c] sm:$0xff]  ;;  %v640_v32 = vld [vmem:[%s2759_s5 + $0x4b0] sm:$0xff] }
  0x95   : >> { %637 = vst [vmem:[%s2755_s28 + $0x130] sm:$0xff] %v636_v30  ;;  %v642_v33 = vld [vmem:[%s2759_s5 + $0x4b8] sm:$0xff]  ;;  %639 = vst [vmem:[%s2755_s28 + $0x138] sm:$0xff] %v638_v31  ;;  %v644_v34 = vld [vmem:[%s2759_s5 + $0x4ec] sm:$0xff] }
  0x96   : >> { %641 = vst [vmem:[%s2755_s28 + $0x140] sm:$0xff] %v640_v32  ;;  %643 = vst [vmem:[%s2755_s28 + $0x148] sm:$0xff] %v642_v33  ;;  %v646_v35 = vld [vmem:[%s2759_s5 + $0x4f4] sm:$0xff]  ;;  %v648_v36 = vld [vmem:[%s2759_s5 + $0x528] sm:$0xff] }
  0x97   : >> { %645 = vst [vmem:[%s2755_s28 + $0x150] sm:$0xff] %v644_v34  ;;  %647 = vst [vmem:[%s2755_s28 + $0x158] sm:$0xff] %v646_v35  ;;  %v650_v37 = vld [vmem:[%s2759_s5 + $0x530] sm:$0xff]  ;;  %v652_v38 = vld [vmem:[%s2759_s5 + $0x564] sm:$0xff] }
  0x98   : >> { %649 = vst [vmem:[%s2755_s28 + $0x160] sm:$0xff] %v648_v36  ;;  %v654_v39 = vld [vmem:[%s2759_s5 + $0x56c] sm:$0xff]  ;;  %651 = vst [vmem:[%s2755_s28 + $0x168] sm:$0xff] %v650_v37  ;;  %v656_v40 = vld [vmem:[%s2759_s5 + $0x5a0] sm:$0xff] }
  0x99   : >> { %653 = vst [vmem:[%s2755_s28 + $0x170] sm:$0xff] %v652_v38  ;;  %655 = vst [vmem:[%s2755_s28 + $0x178] sm:$0xff] %v654_v39  ;;  %v658_v41 = vld [vmem:[%s2759_s5 + $0x5a8] sm:$0xff]  ;;  %v660_v42 = vld [vmem:[%s2759_s5 + $0x5dc] sm:$0xff] }
  0x9a   : >> { %657 = vst [vmem:[%s2755_s28 + $0x180] sm:$0xff] %v656_v40  ;;  %659 = vst [vmem:[%s2755_s28 + $0x188] sm:$0xff] %v658_v41  ;;  %v662_v43 = vld [vmem:[%s2759_s5 + $0x5e4] sm:$0xff]  ;;  %v664_v44 = vld [vmem:[%s2759_s5 + $0x618] sm:$0xff] }
  0x9b   : >> { %661 = vst [vmem:[%s2755_s28 + $0x190] sm:$0xff] %v660_v42  ;;  %v666_v45 = vld [vmem:[%s2759_s5 + $0x620] sm:$0xff]  ;;  %663 = vst [vmem:[%s2755_s28 + $0x198] sm:$0xff] %v662_v43  ;;  %v668_v46 = vld [vmem:[%s2759_s5 + $0x654] sm:$0xff] }
  0x9c   : >> { %665 = vst [vmem:[%s2755_s28 + $0x1a0] sm:$0xff] %v664_v44  ;;  %667 = vst [vmem:[%s2755_s28 + $0x1a8] sm:$0xff] %v666_v45  ;;  %v670_v47 = vld [vmem:[%s2759_s5 + $0x65c] sm:$0xff]  ;;  %v672_v48 = vld [vmem:[%s2759_s5 + $0x690] sm:$0xff] }
  0x9d   : >> { %669 = vst [vmem:[%s2755_s28 + $0x1b0] sm:$0xff] %v668_v46  ;;  %671 = vst [vmem:[%s2755_s28 + $0x1b8] sm:$0xff] %v670_v47  ;;  %v674_v49 = vld [vmem:[%s2759_s5 + $0x698] sm:$0xff]  ;;  %v676_v50 = vld [vmem:[%s2759_s5 + $0x6cc] sm:$0xff] }
  0x9e   : >> { %673 = vst [vmem:[%s2755_s28 + $0x1c0] sm:$0xff] %v672_v48  ;;  %v678_v51 = vld [vmem:[%s2759_s5 + $0x6d4] sm:$0xff]  ;;  %675 = vst [vmem:[%s2755_s28 + $0x1c8] sm:$0xff] %v674_v49  ;;  %v680_v52 = vld [vmem:[%s2759_s5 + $0x708] sm:$0xff] }
  0x9f   : >> { %677 = vst [vmem:[%s2755_s28 + $0x1d0] sm:$0xff] %v676_v50  ;;  %679 = vst [vmem:[%s2755_s28 + $0x1d8] sm:$0xff] %v678_v51  ;;  %v682_v53 = vld [vmem:[%s2759_s5 + $0x710] sm:$0xff]  ;;  %v684_v54 = vld [vmem:[%s2759_s5 + $0x744] sm:$0xff] }
  0xa0   : >> { %681 = vst [vmem:[%s2755_s28 + $0x1e0] sm:$0xff] %v680_v52  ;;  %683 = vst [vmem:[%s2755_s28 + $0x1e8] sm:$0xff] %v682_v53  ;;  %v686_v55 = vld [vmem:[%s2759_s5 + $0x74c] sm:$0xff]  ;;  %v688_v56 = vld [vmem:[%s2759_s5 + $0x780] sm:$0xff] }
  0xa1   : >> { %685 = vst [vmem:[%s2755_s28 + $0x1f0] sm:$0xff] %v684_v54  ;;  %v690_v57 = vld [vmem:[%s2759_s5 + $0x788] sm:$0xff]  ;;  %687 = vst [vmem:[%s2755_s28 + $0x1f8] sm:$0xff] %v686_v55  ;;  %v692_v58 = vld [vmem:[%s2759_s5 + $0x7bc] sm:$0xff] }
  0xa2   : >> { %689 = vst [vmem:[%s2755_s28 + $0x200] sm:$0xff] %v688_v56  ;;  %691 = vst [vmem:[%s2755_s28 + $0x208] sm:$0xff] %v690_v57  ;;  %v694_v59 = vld [vmem:[%s2759_s5 + $0x7c4] sm:$0xff]  ;;  %v696_v60 = vld [vmem:[%s2759_s5 + $0x7f8] sm:$0xff] }
  0xa3   : >> { %693 = vst [vmem:[%s2755_s28 + $0x210] sm:$0xff] %v692_v58  ;;  %695 = vst [vmem:[%s2755_s28 + $0x218] sm:$0xff] %v694_v59  ;;  %v698_v61 = vld [vmem:[%s2759_s5 + $0x800] sm:$0xff]  ;;  %v700_v62 = vld [vmem:[%s2759_s5 + $0x834] sm:$0xff] }
  0xa4   : >> { %697 = vst [vmem:[%s2755_s28 + $0x220] sm:$0xff] %v696_v60  ;;  %v702_v63 = vld [vmem:[%s2759_s5 + $0x83c] sm:$0xff]  ;;  %699 = vst [vmem:[%s2755_s28 + $0x228] sm:$0xff] %v698_v61  ;;  %v704_v0 = vld [vmem:[%s2759_s5 + $0x870] sm:$0xff] }
  0xa5   : >> { %701 = vst [vmem:[%s2755_s28 + $0x230] sm:$0xff] %v700_v62  ;;  %703 = vst [vmem:[%s2755_s28 + $0x238] sm:$0xff] %v702_v63  ;;  %v706_v1 = vld [vmem:[%s2759_s5 + $0x878] sm:$0xff]  ;;  %v708_v2 = vld [vmem:[%s2759_s5 + $0x8ac] sm:$0xff]  ;;  %556 = sbr.rel (!%p553_p11) target bundleno = 129 (0x81), region = 181 }
  0xa6   : >> { %705 = vst [vmem:[%s2755_s28 + $0x240] sm:$0xff] %v704_v0  ;;  %707 = vst [vmem:[%s2755_s28 + $0x248] sm:$0xff] %v706_v1  ;;  %v710_v3 = vld [vmem:[%s2759_s5 + $0x8b4] sm:$0xff]  ;;  %v712_v4 = vld [vmem:[%s2759_s5 + $0x8e8] sm:$0xff] }
  0xa7   : >> { %709 = vst [vmem:[%s2755_s28 + $0x250] sm:$0xff] %v708_v2  ;;  %v714_v5 = vld [vmem:[%s2759_s5 + $0x8f0] sm:$0xff]  ;;  %711 = vst [vmem:[%s2755_s28 + $0x258] sm:$0xff] %v710_v3  ;;  %v716_v6 = vld [vmem:[%s2759_s5 + $0x924] sm:$0xff] }
  0xa8   : >> { %713 = vst [vmem:[%s2755_s28 + $0x260] sm:$0xff] %v712_v4  ;;  %715 = vst [vmem:[%s2755_s28 + $0x268] sm:$0xff] %v714_v5  ;;  %v718_v7 = vld [vmem:[%s2759_s5 + $0x92c] sm:$0xff]  ;;  %s4133_s5 = smov %s3302_s9 }
  0xa9   : >> { %717 = vst [vmem:[%s2755_s28 + $0x270] sm:$0xff] %v716_v6  ;;  %719 = vst [vmem:[%s2755_s28 + $0x278] sm:$0xff] %v718_v7  ;;  %s4132_s28 = smov %s3305_s24 }
  0xaa PF: > { %s3443_s26 = sand.u32 1, %s547_s29   ;;  %s2290_s27 = sshll.u32 %s3235_s20, 8 }
  0xab   : > { %s731_s19 = sshra.s32 %s2290_s27, 4  ;;  %p2116_p12 = scmp.le.s32.totalorder %s3443_s26, 0 }
  0xac   : > { %s3447_s0 = scalar_lea.vmem %s2866_s4, %s731_s19   ;;  %s3450_s24 = scalar_lea.vmem %s2870_s7, %s731_s19 [#allocation2]  }
  0xad   : > { %2062 = sbr.rel (%p2116_p12) target bundleno = 199 (0xc7), region = 186  ;;  %s4135_s28 = smov (!%p2116_p12), %s3450_s24 }
  0xae   : > { %s4136_s5 = smov (!%p2116_p12), %s3447_s0  ;;  %s3459_s25 = smov (!%p2116_p12), 0  }
  0xaf   : > { %s3461_s11 = smov (!%p2116_p12), 0  }
  0xb2 LB: >> { %v747_v8 = vld [vmem:[%s2775_s5] sm:$0xff]  ;;  %v751_v10 = vld [vmem:[%s2775_s5 + $0x78] sm:$0xff]  ;;  %s827_s29 = sadd.s32 1, %s2779_s25  ;;  %v755_v12 = vld [vmem:[%s2775_s5 + $0xf0] sm:$0xff]  ;;  %s741_s11 = sadd.s32 1, %s2783_s11   ;;  %s2783_s11 = sphi %s3461_s11, %s741_s11   ;;  %s2779_s25 = sphi %s3459_s25, %s4139_s25   ;;  %s2775_s5 = sphi %s4136_s5, %s4138_s5   ;;  %s2771_s28 = sphi %s4135_s28, %s4137_s28  }
  0xb3   : >> { %v749_v9 = vld [vmem:[%s2775_s5 + $0x3c] sm:$0xff]  ;;  %748 = vst [vmem:[%s2771_s28] sm:$0xff] %v747_v8  ;;  %752 = vst [vmem:[%s2771_s28 + $0x20] sm:$0xff] %v751_v10  ;;  %v753_v11 = vld [vmem:[%s2775_s5 + $0xb4] sm:$0xff]  ;;  %p828_p13 = scmp.ge.s32.totalorder %s827_s29, %s3443_s26  ;;  %p740_p0 = scmp.ge.s32.totalorder %s741_s11, %s3443_s26 }
  0xb4   : >> { %750 = vst [vmem:[%s2771_s28 + $0x10] sm:$0xff] %v749_v9  ;;  %v757_v13 = vld [vmem:[%s2775_s5 + $0x12c] sm:$0xff]  ;;  %754 = vst [vmem:[%s2771_s28 + $0x30] sm:$0xff] %v753_v11  ;;  %v761_v15 = vld [vmem:[%s2775_s5 + $0x1a4] sm:$0xff] }
  0xb5   : >> { %756 = vst [vmem:[%s2771_s28 + $0x40] sm:$0xff] %v755_v12  ;;  %758 = vst [vmem:[%s2771_s28 + $0x50] sm:$0xff] %v757_v13  ;;  %v759_v14 = vld [vmem:[%s2775_s5 + $0x168] sm:$0xff]  ;;  %v763_v16 = vld [vmem:[%s2775_s5 + $0x1e0] sm:$0xff]  ;;  %s4153_s29 = smov (%p828_p13, %s827_s29), 0 }
  0xb6   : >> { %760 = vst [vmem:[%s2771_s28 + $0x60] sm:$0xff] %v759_v14  ;;  %762 = vst [vmem:[%s2771_s28 + $0x70] sm:$0xff] %v761_v15  ;;  %v765_v17 = vld [vmem:[%s2775_s5 + $0x21c] sm:$0xff]  ;;  %v769_v19 = vld [vmem:[%s2775_s5 + $0x294] sm:$0xff]  ;;  %s2117_s20 = sshll.u32 %s4153_s29, 3  ;;  %s4139_s25 = smov %s4153_s29 }
  0xb7   : >> { %764 = vst [vmem:[%s2771_s28 + $0x80] sm:$0xff] %v763_v16  ;;  %v767_v18 = vld [vmem:[%s2775_s5 + $0x258] sm:$0xff]  ;;  %766 = vst [vmem:[%s2771_s28 + $0x90] sm:$0xff] %v765_v17  ;;  %v771_v20 = vld [vmem:[%s2775_s5 + $0x2d0] sm:$0xff]  ;;  %s3517_s17 = scalar_lea.vmem %s3447_s0, %s2117_s20   ;;  %s3520_s9 = scalar_lea.vmem %s3450_s24, %s2117_s20 [#allocation2]  }
  0xb8   : >> { %768 = vst [vmem:[%s2771_s28 + $0xa0] sm:$0xff] %v767_v18  ;;  %770 = vst [vmem:[%s2771_s28 + $0xb0] sm:$0xff] %v769_v19  ;;  %v773_v21 = vld [vmem:[%s2775_s5 + $0x30c] sm:$0xff]  ;;  %v777_v23 = vld [vmem:[%s2775_s5 + $0x384] sm:$0xff] }
  0xb9   : >> { %v775_v22 = vld [vmem:[%s2775_s5 + $0x348] sm:$0xff]  ;;  %772 = vst [vmem:[%s2771_s28 + $0xc0] sm:$0xff] %v771_v20  ;;  %774 = vst [vmem:[%s2771_s28 + $0xd0] sm:$0xff] %v773_v21  ;;  %v779_v24 = vld [vmem:[%s2775_s5 + $0x3c0] sm:$0xff] }
  0xba   : >> { %776 = vst [vmem:[%s2771_s28 + $0xe0] sm:$0xff] %v775_v22  ;;  %v781_v25 = vld [vmem:[%s2775_s5 + $0x3fc] sm:$0xff]  ;;  %778 = vst [vmem:[%s2771_s28 + $0xf0] sm:$0xff] %v777_v23  ;;  %v785_v27 = vld [vmem:[%s2775_s5 + $0x474] sm:$0xff] }
  0xbb   : >> { %780 = vst [vmem:[%s2771_s28 + $0x100] sm:$0xff] %v779_v24  ;;  %782 = vst [vmem:[%s2771_s28 + $0x110] sm:$0xff] %v781_v25  ;;  %v783_v26 = vld [vmem:[%s2775_s5 + $0x438] sm:$0xff]  ;;  %v787_v28 = vld [vmem:[%s2775_s5 + $0x4b0] sm:$0xff] }
  0xbc   : >> { %784 = vst [vmem:[%s2771_s28 + $0x120] sm:$0xff] %v783_v26  ;;  %786 = vst [vmem:[%s2771_s28 + $0x130] sm:$0xff] %v785_v27  ;;  %v789_v29 = vld [vmem:[%s2775_s5 + $0x4ec] sm:$0xff]  ;;  %v793_v31 = vld [vmem:[%s2775_s5 + $0x564] sm:$0xff] }
  0xbd   : >> { %788 = vst [vmem:[%s2771_s28 + $0x140] sm:$0xff] %v787_v28  ;;  %v791_v30 = vld [vmem:[%s2775_s5 + $0x528] sm:$0xff]  ;;  %790 = vst [vmem:[%s2771_s28 + $0x150] sm:$0xff] %v789_v29  ;;  %v795_v32 = vld [vmem:[%s2775_s5 + $0x5a0] sm:$0xff] }
  0xbe   : >> { %792 = vst [vmem:[%s2771_s28 + $0x160] sm:$0xff] %v791_v30  ;;  %794 = vst [vmem:[%s2771_s28 + $0x170] sm:$0xff] %v793_v31  ;;  %v797_v33 = vld [vmem:[%s2775_s5 + $0x5dc] sm:$0xff]  ;;  %v801_v35 = vld [vmem:[%s2775_s5 + $0x654] sm:$0xff] }
  0xbf   : >> { %v799_v34 = vld [vmem:[%s2775_s5 + $0x618] sm:$0xff]  ;;  %796 = vst [vmem:[%s2771_s28 + $0x180] sm:$0xff] %v795_v32  ;;  %798 = vst [vmem:[%s2771_s28 + $0x190] sm:$0xff] %v797_v33  ;;  %v803_v36 = vld [vmem:[%s2775_s5 + $0x690] sm:$0xff] }
  0xc0   : >> { %800 = vst [vmem:[%s2771_s28 + $0x1a0] sm:$0xff] %v799_v34  ;;  %v805_v37 = vld [vmem:[%s2775_s5 + $0x6cc] sm:$0xff]  ;;  %802 = vst [vmem:[%s2771_s28 + $0x1b0] sm:$0xff] %v801_v35  ;;  %v809_v39 = vld [vmem:[%s2775_s5 + $0x744] sm:$0xff] }
  0xc1   : >> { %804 = vst [vmem:[%s2771_s28 + $0x1c0] sm:$0xff] %v803_v36  ;;  %806 = vst [vmem:[%s2771_s28 + $0x1d0] sm:$0xff] %v805_v37  ;;  %v807_v38 = vld [vmem:[%s2775_s5 + $0x708] sm:$0xff]  ;;  %v811_v40 = vld [vmem:[%s2775_s5 + $0x780] sm:$0xff] }
  0xc2   : >> { %808 = vst [vmem:[%s2771_s28 + $0x1e0] sm:$0xff] %v807_v38  ;;  %810 = vst [vmem:[%s2771_s28 + $0x1f0] sm:$0xff] %v809_v39  ;;  %v813_v41 = vld [vmem:[%s2775_s5 + $0x7bc] sm:$0xff]  ;;  %v817_v43 = vld [vmem:[%s2775_s5 + $0x834] sm:$0xff]  ;;  %743 = sbr.rel (!%p740_p0) target bundleno = 178 (0xb2), region = 192 }
  0xc3   : >> { %812 = vst [vmem:[%s2771_s28 + $0x200] sm:$0xff] %v811_v40  ;;  %v815_v42 = vld [vmem:[%s2775_s5 + $0x7f8] sm:$0xff]  ;;  %814 = vst [vmem:[%s2771_s28 + $0x210] sm:$0xff] %v813_v41  ;;  %v819_v44 = vld [vmem:[%s2775_s5 + $0x870] sm:$0xff] }
  0xc4   : >> { %816 = vst [vmem:[%s2771_s28 + $0x220] sm:$0xff] %v815_v42  ;;  %818 = vst [vmem:[%s2771_s28 + $0x230] sm:$0xff] %v817_v43  ;;  %v821_v45 = vld [vmem:[%s2775_s5 + $0x8ac] sm:$0xff]  ;;  %v825_v47 = vld [vmem:[%s2775_s5 + $0x924] sm:$0xff] }
  0xc5   : >> { %v823_v46 = vld [vmem:[%s2775_s5 + $0x8e8] sm:$0xff]  ;;  %820 = vst [vmem:[%s2771_s28 + $0x240] sm:$0xff] %v819_v44  ;;  %822 = vst [vmem:[%s2771_s28 + $0x250] sm:$0xff] %v821_v45  ;;  %s4138_s5 = smov %s3517_s17 }
  0xc6   : >> { %824 = vst [vmem:[%s2771_s28 + $0x260] sm:$0xff] %v823_v46  ;;  %826 = vst [vmem:[%s2771_s28 + $0x270] sm:$0xff] %v825_v47  ;;  %s4137_s28 = smov %s3520_s9 }
  0xc7 PF: > { %s2785_s27 = smov 1  }
  0xc8   : > { %s834_s19 = sshll.u32 %s2785_s27, %s2874_s8 }
  0xc9   : > { %s3577_s11 = sadd.s32 4294967295, %s834_s19 }
  0xca   : > { %v844_v48 = vld [vmem:[%s3228_s30] sm:%s3577_s11]  ;;  %v848_v50 = vld [vmem:[%s3228_s30 + $0x78] sm:%s3577_s11] }
  0xcb   : > { %v846_v49 = vld [vmem:[%s3228_s30 + $0x3c] sm:%s3577_s11]  ;;  %845 = vst [vmem:[%s3231_s10] sm:%s3577_s11] %v844_v48 }
  0xcc   : > { %847 = vst [vmem:[%s3231_s10 + $0x10] sm:%s3577_s11] %v846_v49  ;;  %v850_v51 = vld [vmem:[%s3228_s30 + $0xb4] sm:%s3577_s11] }
  0xcd   : > { %849 = vst [vmem:[%s3231_s10 + $0x20] sm:%s3577_s11] %v848_v50  ;;  %851 = vst [vmem:[%s3231_s10 + $0x30] sm:%s3577_s11] %v850_v51 }
  0xce   : > { %v852_v52 = vld [vmem:[%s3228_s30 + $0xf0] sm:%s3577_s11]  ;;  %v856_v54 = vld [vmem:[%s3228_s30 + $0x168] sm:%s3577_s11] }
  0xcf   : > { %v854_v53 = vld [vmem:[%s3228_s30 + $0x12c] sm:%s3577_s11]  ;;  %853 = vst [vmem:[%s3231_s10 + $0x40] sm:%s3577_s11] %v852_v52 }
  0xd0   : > { %855 = vst [vmem:[%s3231_s10 + $0x50] sm:%s3577_s11] %v854_v53  ;;  %v858_v55 = vld [vmem:[%s3228_s30 + $0x1a4] sm:%s3577_s11] }
  0xd1   : > { %857 = vst [vmem:[%s3231_s10 + $0x60] sm:%s3577_s11] %v856_v54  ;;  %859 = vst [vmem:[%s3231_s10 + $0x70] sm:%s3577_s11] %v858_v55 }
  0xd2   : > { %v860_v56 = vld [vmem:[%s3228_s30 + $0x1e0] sm:%s3577_s11]  ;;  %v864_v58 = vld [vmem:[%s3228_s30 + $0x258] sm:%s3577_s11] }
  0xd3   : > { %v862_v57 = vld [vmem:[%s3228_s30 + $0x21c] sm:%s3577_s11]  ;;  %861 = vst [vmem:[%s3231_s10 + $0x80] sm:%s3577_s11] %v860_v56 }
  0xd4   : > { %863 = vst [vmem:[%s3231_s10 + $0x90] sm:%s3577_s11] %v862_v57  ;;  %v866_v59 = vld [vmem:[%s3228_s30 + $0x294] sm:%s3577_s11] }
  0xd5   : > { %865 = vst [vmem:[%s3231_s10 + $0xa0] sm:%s3577_s11] %v864_v58  ;;  %867 = vst [vmem:[%s3231_s10 + $0xb0] sm:%s3577_s11] %v866_v59 }
  0xd6   : > { %v868_v60 = vld [vmem:[%s3228_s30 + $0x2d0] sm:%s3577_s11]  ;;  %v872_v62 = vld [vmem:[%s3228_s30 + $0x348] sm:%s3577_s11] }
  0xd7   : > { %v870_v61 = vld [vmem:[%s3228_s30 + $0x30c] sm:%s3577_s11]  ;;  %869 = vst [vmem:[%s3231_s10 + $0xc0] sm:%s3577_s11] %v868_v60 }
  0xd8   : > { %871 = vst [vmem:[%s3231_s10 + $0xd0] sm:%s3577_s11] %v870_v61  ;;  %v874_v63 = vld [vmem:[%s3228_s30 + $0x384] sm:%s3577_s11] }
  0xd9   : > { %873 = vst [vmem:[%s3231_s10 + $0xe0] sm:%s3577_s11] %v872_v62  ;;  %875 = vst [vmem:[%s3231_s10 + $0xf0] sm:%s3577_s11] %v874_v63 }
  0xda   : > { %v876_v0 = vld [vmem:[%s3228_s30 + $0x3c0] sm:%s3577_s11]  ;;  %v880_v2 = vld [vmem:[%s3228_s30 + $0x438] sm:%s3577_s11] }
  0xdb   : > { %v878_v1 = vld [vmem:[%s3228_s30 + $0x3fc] sm:%s3577_s11]  ;;  %877 = vst [vmem:[%s3231_s10 + $0x100] sm:%s3577_s11] %v876_v0 }
  0xdc   : > { %879 = vst [vmem:[%s3231_s10 + $0x110] sm:%s3577_s11] %v878_v1  ;;  %v882_v3 = vld [vmem:[%s3228_s30 + $0x474] sm:%s3577_s11] }
  0xdd   : > { %881 = vst [vmem:[%s3231_s10 + $0x120] sm:%s3577_s11] %v880_v2  ;;  %883 = vst [vmem:[%s3231_s10 + $0x130] sm:%s3577_s11] %v882_v3 }
  0xde   : > { %v884_v4 = vld [vmem:[%s3228_s30 + $0x4b0] sm:%s3577_s11]  ;;  %v888_v6 = vld [vmem:[%s3228_s30 + $0x528] sm:%s3577_s11] }
  0xdf   : > { %v886_v5 = vld [vmem:[%s3228_s30 + $0x4ec] sm:%s3577_s11]  ;;  %885 = vst [vmem:[%s3231_s10 + $0x140] sm:%s3577_s11] %v884_v4 }
  0xe0   : > { %887 = vst [vmem:[%s3231_s10 + $0x150] sm:%s3577_s11] %v886_v5  ;;  %v890_v7 = vld [vmem:[%s3228_s30 + $0x564] sm:%s3577_s11] }
  0xe1   : > { %889 = vst [vmem:[%s3231_s10 + $0x160] sm:%s3577_s11] %v888_v6  ;;  %891 = vst [vmem:[%s3231_s10 + $0x170] sm:%s3577_s11] %v890_v7 }
  0xe2   : > { %v892_v8 = vld [vmem:[%s3228_s30 + $0x5a0] sm:%s3577_s11]  ;;  %v896_v10 = vld [vmem:[%s3228_s30 + $0x618] sm:%s3577_s11] }
  0xe3   : > { %v894_v9 = vld [vmem:[%s3228_s30 + $0x5dc] sm:%s3577_s11]  ;;  %893 = vst [vmem:[%s3231_s10 + $0x180] sm:%s3577_s11] %v892_v8 }
  0xe4   : > { %895 = vst [vmem:[%s3231_s10 + $0x190] sm:%s3577_s11] %v894_v9  ;;  %v898_v11 = vld [vmem:[%s3228_s30 + $0x654] sm:%s3577_s11] }
  0xe5   : > { %897 = vst [vmem:[%s3231_s10 + $0x1a0] sm:%s3577_s11] %v896_v10  ;;  %899 = vst [vmem:[%s3231_s10 + $0x1b0] sm:%s3577_s11] %v898_v11 }
  0xe6   : > { %v900_v12 = vld [vmem:[%s3228_s30 + $0x690] sm:%s3577_s11]  ;;  %v904_v14 = vld [vmem:[%s3228_s30 + $0x708] sm:%s3577_s11] }
  0xe7   : > { %v902_v13 = vld [vmem:[%s3228_s30 + $0x6cc] sm:%s3577_s11]  ;;  %901 = vst [vmem:[%s3231_s10 + $0x1c0] sm:%s3577_s11] %v900_v12 }
  0xe8   : > { %903 = vst [vmem:[%s3231_s10 + $0x1d0] sm:%s3577_s11] %v902_v13  ;;  %v906_v15 = vld [vmem:[%s3228_s30 + $0x744] sm:%s3577_s11] }
  0xe9   : > { %905 = vst [vmem:[%s3231_s10 + $0x1e0] sm:%s3577_s11] %v904_v14  ;;  %907 = vst [vmem:[%s3231_s10 + $0x1f0] sm:%s3577_s11] %v906_v15 }
  0xea   : > { %v908_v16 = vld [vmem:[%s3228_s30 + $0x780] sm:%s3577_s11]  ;;  %v912_v18 = vld [vmem:[%s3228_s30 + $0x7f8] sm:%s3577_s11] }
  0xeb   : > { %v910_v17 = vld [vmem:[%s3228_s30 + $0x7bc] sm:%s3577_s11]  ;;  %909 = vst [vmem:[%s3231_s10 + $0x200] sm:%s3577_s11] %v908_v16 }
  0xec   : > { %911 = vst [vmem:[%s3231_s10 + $0x210] sm:%s3577_s11] %v910_v17  ;;  %v914_v19 = vld [vmem:[%s3228_s30 + $0x834] sm:%s3577_s11] }
  0xed   : > { %913 = vst [vmem:[%s3231_s10 + $0x220] sm:%s3577_s11] %v912_v18  ;;  %915 = vst [vmem:[%s3231_s10 + $0x230] sm:%s3577_s11] %v914_v19 }
  0xee   : > { %v916_v20 = vld [vmem:[%s3228_s30 + $0x870] sm:%s3577_s11]  ;;  %v920_v22 = vld [vmem:[%s3228_s30 + $0x8e8] sm:%s3577_s11] }
  0xef   : > { %v918_v21 = vld [vmem:[%s3228_s30 + $0x8ac] sm:%s3577_s11]  ;;  %917 = vst [vmem:[%s3231_s10 + $0x240] sm:%s3577_s11] %v916_v20 }
  0xf0   : > { %919 = vst [vmem:[%s3231_s10 + $0x250] sm:%s3577_s11] %v918_v21  ;;  %v922_v23 = vld [vmem:[%s3228_s30 + $0x924] sm:%s3577_s11] }
  0xf1   : > { %921 = vst [vmem:[%s3231_s10 + $0x260] sm:%s3577_s11] %v920_v22  ;;  %923 = vst [vmem:[%s3231_s10 + $0x270] sm:%s3577_s11] %v922_v23 }
  0xf2 PF: > { %p2120_p1 = scmp.ge.u32.totalorder %s2868_s6, 8 }
  0xf3   : > { %s2786_s0 = smov (!%p2120_p1), 1  }
  0xf4   : > { %156 = sbr.rel (%p2120_p1) target bundleno = 289 (0x121), region = 40  ;;  %s157_s8 = sshll.u32 (!%p2120_p1), %s2786_s0, %s2868_s6 }
  0xf5   : > { %s3741_s30 = sadd.s32 (!%p2120_p1), 4294967295, %s157_s8 }
  0xf9   : > { %v167_v24 = vld [vmem:[%s2866_s4] sm:%s3741_s30]  ;;  %v171_v26 = vld [vmem:[%s2866_s4 + $0x78] sm:%s3741_s30] }
  0xfa   : > { %v169_v25 = vld [vmem:[%s2866_s4 + $0x3c] sm:%s3741_s30]  ;;  %168 = vst [vmem:[%s2870_s7] sm:%s3741_s30] %v167_v24 }
  0xfb   : > { %170 = vst [vmem:[%s2870_s7 + $0x10] sm:%s3741_s30] %v169_v25  ;;  %v173_v27 = vld [vmem:[%s2866_s4 + $0xb4] sm:%s3741_s30] }
  0xfc   : > { %172 = vst [vmem:[%s2870_s7 + $0x20] sm:%s3741_s30] %v171_v26  ;;  %174 = vst [vmem:[%s2870_s7 + $0x30] sm:%s3741_s30] %v173_v27 }
  0xfd   : > { %v175_v28 = vld [vmem:[%s2866_s4 + $0xf0] sm:%s3741_s30]  ;;  %v179_v30 = vld [vmem:[%s2866_s4 + $0x168] sm:%s3741_s30] }
  0xfe   : > { %v177_v29 = vld [vmem:[%s2866_s4 + $0x12c] sm:%s3741_s30]  ;;  %176 = vst [vmem:[%s2870_s7 + $0x40] sm:%s3741_s30] %v175_v28 }
  0xff   : > { %178 = vst [vmem:[%s2870_s7 + $0x50] sm:%s3741_s30] %v177_v29  ;;  %v181_v31 = vld [vmem:[%s2866_s4 + $0x1a4] sm:%s3741_s30] }
 0x100   : > { %180 = vst [vmem:[%s2870_s7 + $0x60] sm:%s3741_s30] %v179_v30  ;;  %182 = vst [vmem:[%s2870_s7 + $0x70] sm:%s3741_s30] %v181_v31 }
 0x101   : > { %v183_v32 = vld [vmem:[%s2866_s4 + $0x1e0] sm:%s3741_s30]  ;;  %v187_v34 = vld [vmem:[%s2866_s4 + $0x258] sm:%s3741_s30] }
 0x102   : > { %v185_v33 = vld [vmem:[%s2866_s4 + $0x21c] sm:%s3741_s30]  ;;  %184 = vst [vmem:[%s2870_s7 + $0x80] sm:%s3741_s30] %v183_v32 }
 0x103   : > { %186 = vst [vmem:[%s2870_s7 + $0x90] sm:%s3741_s30] %v185_v33  ;;  %v189_v35 = vld [vmem:[%s2866_s4 + $0x294] sm:%s3741_s30] }
 0x104   : > { %188 = vst [vmem:[%s2870_s7 + $0xa0] sm:%s3741_s30] %v187_v34  ;;  %190 = vst [vmem:[%s2870_s7 + $0xb0] sm:%s3741_s30] %v189_v35 }
 0x105   : > { %v191_v36 = vld [vmem:[%s2866_s4 + $0x2d0] sm:%s3741_s30]  ;;  %v195_v38 = vld [vmem:[%s2866_s4 + $0x348] sm:%s3741_s30] }
 0x106   : > { %v193_v37 = vld [vmem:[%s2866_s4 + $0x30c] sm:%s3741_s30]  ;;  %192 = vst [vmem:[%s2870_s7 + $0xc0] sm:%s3741_s30] %v191_v36 }
 0x107   : > { %194 = vst [vmem:[%s2870_s7 + $0xd0] sm:%s3741_s30] %v193_v37  ;;  %v197_v39 = vld [vmem:[%s2866_s4 + $0x384] sm:%s3741_s30] }
 0x108   : > { %196 = vst [vmem:[%s2870_s7 + $0xe0] sm:%s3741_s30] %v195_v38  ;;  %198 = vst [vmem:[%s2870_s7 + $0xf0] sm:%s3741_s30] %v197_v39 }
 0x109   : > { %v199_v40 = vld [vmem:[%s2866_s4 + $0x3c0] sm:%s3741_s30]  ;;  %v203_v42 = vld [vmem:[%s2866_s4 + $0x438] sm:%s3741_s30] }
 0x10a   : > { %v201_v41 = vld [vmem:[%s2866_s4 + $0x3fc] sm:%s3741_s30]  ;;  %200 = vst [vmem:[%s2870_s7 + $0x100] sm:%s3741_s30] %v199_v40 }
 0x10b   : > { %202 = vst [vmem:[%s2870_s7 + $0x110] sm:%s3741_s30] %v201_v41  ;;  %v205_v43 = vld [vmem:[%s2866_s4 + $0x474] sm:%s3741_s30] }
 0x10c   : > { %204 = vst [vmem:[%s2870_s7 + $0x120] sm:%s3741_s30] %v203_v42  ;;  %206 = vst [vmem:[%s2870_s7 + $0x130] sm:%s3741_s30] %v205_v43 }
 0x10d   : > { %v207_v44 = vld [vmem:[%s2866_s4 + $0x4b0] sm:%s3741_s30]  ;;  %v211_v46 = vld [vmem:[%s2866_s4 + $0x528] sm:%s3741_s30] }
 0x10e   : > { %v209_v45 = vld [vmem:[%s2866_s4 + $0x4ec] sm:%s3741_s30]  ;;  %208 = vst [vmem:[%s2870_s7 + $0x140] sm:%s3741_s30] %v207_v44 }
 0x10f   : > { %210 = vst [vmem:[%s2870_s7 + $0x150] sm:%s3741_s30] %v209_v45  ;;  %v213_v47 = vld [vmem:[%s2866_s4 + $0x564] sm:%s3741_s30] }
 0x110   : > { %212 = vst [vmem:[%s2870_s7 + $0x160] sm:%s3741_s30] %v211_v46  ;;  %214 = vst [vmem:[%s2870_s7 + $0x170] sm:%s3741_s30] %v213_v47 }
 0x111   : > { %v215_v48 = vld [vmem:[%s2866_s4 + $0x5a0] sm:%s3741_s30]  ;;  %v219_v50 = vld [vmem:[%s2866_s4 + $0x618] sm:%s3741_s30] }
 0x112   : > { %v217_v49 = vld [vmem:[%s2866_s4 + $0x5dc] sm:%s3741_s30]  ;;  %216 = vst [vmem:[%s2870_s7 + $0x180] sm:%s3741_s30] %v215_v48 }
 0x113   : > { %218 = vst [vmem:[%s2870_s7 + $0x190] sm:%s3741_s30] %v217_v49  ;;  %v221_v51 = vld [vmem:[%s2866_s4 + $0x654] sm:%s3741_s30] }
 0x114   : > { %220 = vst [vmem:[%s2870_s7 + $0x1a0] sm:%s3741_s30] %v219_v50  ;;  %222 = vst [vmem:[%s2870_s7 + $0x1b0] sm:%s3741_s30] %v221_v51 }
 0x115   : > { %v223_v52 = vld [vmem:[%s2866_s4 + $0x690] sm:%s3741_s30]  ;;  %v227_v54 = vld [vmem:[%s2866_s4 + $0x708] sm:%s3741_s30] }
 0x116   : > { %v225_v53 = vld [vmem:[%s2866_s4 + $0x6cc] sm:%s3741_s30]  ;;  %224 = vst [vmem:[%s2870_s7 + $0x1c0] sm:%s3741_s30] %v223_v52 }
 0x117   : > { %226 = vst [vmem:[%s2870_s7 + $0x1d0] sm:%s3741_s30] %v225_v53  ;;  %v229_v55 = vld [vmem:[%s2866_s4 + $0x744] sm:%s3741_s30] }
 0x118   : > { %228 = vst [vmem:[%s2870_s7 + $0x1e0] sm:%s3741_s30] %v227_v54  ;;  %230 = vst [vmem:[%s2870_s7 + $0x1f0] sm:%s3741_s30] %v229_v55 }
 0x119   : > { %v231_v56 = vld [vmem:[%s2866_s4 + $0x780] sm:%s3741_s30]  ;;  %v235_v58 = vld [vmem:[%s2866_s4 + $0x7f8] sm:%s3741_s30] }
 0x11a   : > { %v233_v57 = vld [vmem:[%s2866_s4 + $0x7bc] sm:%s3741_s30]  ;;  %232 = vst [vmem:[%s2870_s7 + $0x200] sm:%s3741_s30] %v231_v56 }
 0x11b   : > { %234 = vst [vmem:[%s2870_s7 + $0x210] sm:%s3741_s30] %v233_v57  ;;  %v237_v59 = vld [vmem:[%s2866_s4 + $0x834] sm:%s3741_s30] }
 0x11c   : > { %236 = vst [vmem:[%s2870_s7 + $0x220] sm:%s3741_s30] %v235_v58  ;;  %238 = vst [vmem:[%s2870_s7 + $0x230] sm:%s3741_s30] %v237_v59 }
 0x11d   : > { %v239_v60 = vld [vmem:[%s2866_s4 + $0x870] sm:%s3741_s30]  ;;  %v243_v62 = vld [vmem:[%s2866_s4 + $0x8e8] sm:%s3741_s30] }
 0x11e   : > { %v241_v61 = vld [vmem:[%s2866_s4 + $0x8ac] sm:%s3741_s30]  ;;  %240 = vst [vmem:[%s2870_s7 + $0x240] sm:%s3741_s30] %v239_v60 }
 0x11f   : > { %242 = vst [vmem:[%s2870_s7 + $0x250] sm:%s3741_s30] %v241_v61  ;;  %v245_v63 = vld [vmem:[%s2866_s4 + $0x924] sm:%s3741_s30] }
 0x120   : > { %244 = vst [vmem:[%s2870_s7 + $0x260] sm:%s3741_s30] %v243_v62  ;;  %246 = vst [vmem:[%s2870_s7 + $0x270] sm:%s3741_s30] %v245_v63 }
 0x121 PF: > { %p2122_p2 = scmp.ge.s32.totalorder %s2719_s15, 1  ;;  %p926_p3 = scmp.lt.s32.totalorder %s2719_s15, 5 }
 0x123   : > { %p927_p4 = pnand %p2122_p2, %p926_p3 }
 0x124   : > { %s3906_s6 = sand.u32 (!%p927_p4), 1, %s2711_s13  }
 0x125   : > { %930 = sbr.rel (%p927_p4) target bundleno = 619 (0x26b), region = 94  ;;  %s2123_s29 = sshll.u32 (!%p927_p4), %s3906_s6, 5 }
 0x126   : > { %s2300_s7 = smul.u32 (!%p927_p4), 640, %s3906_s6  ;;  %s955_s20 = scalar_lea.vmem (!%p927_p4), [#allocation3], %s2123_s29 }
 0x127   : > { %s1922_s17 = scalar_lea.sflag (!%p927_p4), [#allocation4], %s3906_s6 }
 0x128   : > { %s3920_s28 = scalar_lea.vmem (!%p927_p4), [#allocation2], %s2300_s7 }
 0x12a   : > { %vm1094_vm0 = vcmask 1044480   ;;  %vm1095_vm1 = vcmask 1045504   ;;  %v1865_v0 = vld [vmem:[%s4114_s2] sm:$0xff]  ;;  %v2787_v1 = vmov 65535   ;;  %v2788_v3 = vmov 0   ;;  %s2278_s9 = sshll.u32 (%p2851_p6), %s2833_s16, 2 }
 0x12b   : > { %v1096_v2 = vsel %vm1094_vm0, 4294967295, %v2787_v1  ;;  %1142 = vmatprep.mubr.bf16.mxu0 %v2788_v3  ;;  %1185 = vmatprep.mubr.bf16.mxu1 %v2788_v3  ;;  %v1866_v5 = vld [vmem:[%s4114_s2 + $0x8] sm:$0x3]  ;;  %v2474_v6 = vld [vmem:[%s3920_s28 + $0x84] ss:$16 sps:$4 sm:$0x3f]  }
 0x12c   : > { %2473 = vset.pattern.permute.xlu0 %v2788_v3  ;;  %v3915_v4 = vsel %vm1095_vm1, %v1096_v2, 0  ;;  %v2476_v7 = vld [vmem:[%s3920_s28 + $0x8c] ss:$16 sps:$4 sm:$0x3f]   ;;  %v2480_v12 = vld [vmem:[%s3920_s28 + $0x64] ss:$16 sps:$4 sm:$0xff]  }
 0x12d   : > { %1869 = vperm.xlu0 %2473, %v1865_v0   ;;  %v1102_v8 = vand.u32 %v2474_v6, %v3915_v4  ;;  %v2478_v9 = vld [vmem:[%s3920_s28 + $0x80] ss:$16 sps:$4 sm:$0x3f]   ;;  %v2479_v10 = vld [vmem:[%s3920_s28 + $0x88] ss:$16 sps:$4 sm:$0x3f]   ;;  %v1108_v11 = vand.u32 %v2476_v7, %v3915_v4 }
 0x12e   : > { %v1099_v13 = vand.u32 %v2478_v9, %v3915_v4  ;;  %v1105_v14 = vand.u32 %v2479_v10, %v3915_v4  ;;  %v2482_v15 = vld [vmem:[%s3920_s28 + $0x6c] ss:$16 sps:$4 sm:$0xff]   ;;  %v2484_v16 = vld [vmem:[%s3920_s28 + $0x60] ss:$16 sps:$4 sm:$0xff]   ;;  %v2485_v17 = vld [vmem:[%s3920_s28 + $0x68] ss:$16 sps:$4 sm:$0xff]  }
 0x12f   : > { %1116 = vmatprep.subr.bf16.mxu0 %v1102_v8  ;;  %1159 = vmatprep.subr.bf16.mxu1 %v1108_v11  ;;  %v2486_v18 = vld [vmem:[%s3920_s28 + $0x44] ss:$16 sps:$4 sm:$0xff]   ;;  %v2488_v19 = vld [vmem:[%s3920_s28 + $0x4c] ss:$16 sps:$4 sm:$0xff]   ;;  %v2490_v20 = vld [vmem:[%s3920_s28 + $0x40] ss:$16 sps:$4 sm:$0xff]  }
 0x130   : > { %1117 = vmatpush1.bf16.msra.mxu0 %v1099_v13  ;;  %1160 = vmatpush1.bf16.msra.mxu1 %v1105_v14  ;;  %v2491_v21 = vld [vmem:[%s3920_s28 + $0x48] ss:$16 sps:$4 sm:$0xff]   ;;  %v2492_v22 = vld [vmem:[%s3920_s28 + $0x24] ss:$16 sps:$4 sm:$0xff]   ;;  %v2494_v23 = vld [vmem:[%s3920_s28 + $0x2c] ss:$16 sps:$4 sm:$0xff]  }
 0x131   : > { %1874 = vperm.xlu0 %2473, %v1866_v5   ;;  %1118 = vmatprep.subr.bf16.mxu0 %v2480_v12  ;;  %v2496_v24 = vld [vmem:[%s3920_s28 + $0x20] ss:$16 sps:$4 sm:$0xff]   ;;  %v2497_v25 = vld [vmem:[%s3920_s28 + $0x28] ss:$16 sps:$4 sm:$0xff]   ;;  %v2498_v26 = vld [vmem:[%s3920_s28 + $0x4] ss:$16 sps:$4 sm:$0xff]  }
 0x132   : > { %1161 = vmatprep.subr.bf16.mxu1 %v2482_v15  ;;  %v2500_v27 = vld [vmem:[%s3920_s28 + $0xc] ss:$16 sps:$4 sm:$0xff]   ;;  %v2507_v28 = vld [vmem:[%s3920_s28 + $0x124] ss:$16 sps:$4 sm:$0x3f]   ;;  %vm1090_vm2 = vcmask 613376  }
 0x133   : > { %v2502_v29 = vld [vmem:[%s3920_s28] ss:$16 sps:$4 sm:$0xff]   ;;  %v2510_v30 = vld [vmem:[%s3920_s28 + $0x12c] ss:$16 sps:$4 sm:$0x3f]   ;;  %v1317_v34 = vand.u32 %v2507_v28, %v3915_v4  ;;  %s1930_s27 = ssub.s32 (%p2851_p6), 15, %s2278_s9 }
 0x134   : > { %1119 = vmatpush1.bf16.msra.mxu0 %v2484_v16  ;;  %1162 = vmatpush1.bf16.msra.mxu1 %v2485_v17  ;;  %v2503_v31 = vld [vmem:[%s3920_s28 + $0x8] ss:$16 sps:$4 sm:$0xff]   ;;  %v2505_v32 = vld [vmem:[%s3920_s28 + $0x120] ss:$16 sps:$4 sm:$0x3f]   ;;  %v1323_v35 = vand.u32 %v2510_v30, %v3915_v4  ;;  %p1931_p5 = scmp.lt.s32.totalorder (%p2851_p6), %s1930_s27, 4 }
 0x135   : > { %1120 = vmatprep.subr.bf16.mxu0 %v2486_v18  ;;  %1163 = vmatprep.subr.bf16.mxu1 %v2488_v19  ;;  %v2508_v33 = vld [vmem:[%s3920_s28 + $0x128] ss:$16 sps:$4 sm:$0x3f]   ;;  %v3955_v36 = vld [vmem:[%s4113_s1] sm:$0x1f]   ;;  %v1314_v37 = vand.u32 %v2505_v32, %v3915_v4 }
 0x136   : > { %v1320_v38 = vand.u32 %v2508_v33, %v3915_v4  ;;  %v2513_v39 = vld [vmem:[%s3920_s28 + $0x104] ss:$16 sps:$4 sm:$0xff]   ;;  %v2516_v40 = vld [vmem:[%s3920_s28 + $0x10c] ss:$16 sps:$4 sm:$0xff]   ;;  %v2511_v41 = vld [vmem:[%s3920_s28 + $0x100] ss:$16 sps:$4 sm:$0xff]  }
 0x137   : > { %v2514_v42 = vld [vmem:[%s3920_s28 + $0x108] ss:$16 sps:$4 sm:$0xff]   ;;  %v2519_v43 = vld [vmem:[%s3920_s28 + $0xe4] ss:$16 sps:$4 sm:$0xff]   ;;  %v2522_v44 = vld [vmem:[%s3920_s28 + $0xec] ss:$16 sps:$4 sm:$0xff]  }
 0x138   : > { %1121 = vmatpush1.bf16.msra.mxu0 %v2490_v20  ;;  %1164 = vmatpush1.bf16.msra.mxu1 %v2491_v21  ;;  %v2517_v45 = vld [vmem:[%s3920_s28 + $0xe0] ss:$16 sps:$4 sm:$0xff]   ;;  %v2520_v46 = vld [vmem:[%s3920_s28 + $0xe8] ss:$16 sps:$4 sm:$0xff]   ;;  %v2525_v47 = vld [vmem:[%s3920_s28 + $0xc4] ss:$16 sps:$4 sm:$0xff]  }
 0x139   : > { %1122 = vmatprep.subr.bf16.mxu0 %v2492_v22  ;;  %1165 = vmatprep.subr.bf16.mxu1 %v2494_v23  ;;  %v2528_v48 = vld [vmem:[%s3920_s28 + $0xcc] ss:$16 sps:$4 sm:$0xff]   ;;  %v2523_v49 = vld [vmem:[%s3920_s28 + $0xc0] ss:$16 sps:$4 sm:$0xff]   ;;  %v2526_v50 = vld [vmem:[%s3920_s28 + $0xc8] ss:$16 sps:$4 sm:$0xff]  }
 0x13a   : > { %v2531_v51 = vld [vmem:[%s3920_s28 + $0xa4] ss:$16 sps:$4 sm:$0xff]   ;;  %v2534_v53 = vld [vmem:[%s3920_s28 + $0xac] ss:$16 sps:$4 sm:$0xff]   ;;  %v2529_v55 = vld [vmem:[%s3920_s28 + $0xa0] ss:$16 sps:$4 sm:$0xff]  }
 0x13b   : > { %v2537_v52 = vld [vmem:[%s3920_s28 + $0x1c4] ss:$16 sps:$4 sm:$0x3f]   ;;  %v2540_v54 = vld [vmem:[%s3920_s28 + $0x1cc] ss:$16 sps:$4 sm:$0x3f]  }
 0x13c   : > { %1123 = vmatpush1.bf16.msra.mxu0 %v2496_v24  ;;  %1166 = vmatpush1.bf16.msra.mxu1 %v2497_v25  ;;  %v2532_v56 = vld [vmem:[%s3920_s28 + $0xa8] ss:$16 sps:$4 sm:$0xff]   ;;  %v2535_v57 = vld [vmem:[%s3920_s28 + $0x1c0] ss:$16 sps:$4 sm:$0x3f]   ;;  %v1540_v59 = vand.u32 %v2537_v52, %v3915_v4  ;;  %v1546_v60 = vand.u32 %v2540_v54, %v3915_v4 }
 0x13d   : > { %1124 = vmatprep.subr.bf16.mxu0 %v2498_v26  ;;  %1167 = vmatprep.subr.bf16.mxu1 %v2500_v27  ;;  %v2538_v58 = vld [vmem:[%s3920_s28 + $0x1c8] ss:$16 sps:$4 sm:$0x3f]   ;;  %v1537_v61 = vand.u32 %v2535_v57, %v3915_v4  ;;  %v2543_v63 = vld [vmem:[%s3920_s28 + $0x1a4] ss:$16 sps:$4 sm:$0xff]  }
 0x13e   : > { %v1543_v62 = vand.u32 %v2538_v58, %v3915_v4  ;;  %v2546_v0 = vld [vmem:[%s3920_s28 + $0x1ac] ss:$16 sps:$4 sm:$0xff]   ;;  %v2541_v1 = vld [vmem:[%s3920_s28 + $0x1a0] ss:$16 sps:$4 sm:$0xff]   ;;  %v2544_v2 = vld [vmem:[%s3920_s28 + $0x1a8] ss:$16 sps:$4 sm:$0xff]  }
 0x13f   : > { %v2549_v5 = vld [vmem:[%s3920_s28 + $0x184] ss:$16 sps:$4 sm:$0xff]   ;;  %v2552_v6 = vld [vmem:[%s3920_s28 + $0x18c] ss:$16 sps:$4 sm:$0xff]   ;;  %v2547_v7 = vld [vmem:[%s3920_s28 + $0x180] ss:$16 sps:$4 sm:$0xff]  }
 0x140   : > { %1125 = vmatpush1.bf16.msra.mxu0 %v2502_v29  ;;  %1168 = vmatpush1.bf16.msra.mxu1 %v2503_v31  ;;  %v2550_v8 = vld [vmem:[%s3920_s28 + $0x188] ss:$16 sps:$4 sm:$0xff]   ;;  %v2555_v9 = vld [vmem:[%s3920_s28 + $0x164] ss:$16 sps:$4 sm:$0xff]   ;;  %v2558_v10 = vld [vmem:[%s3920_s28 + $0x16c] ss:$16 sps:$4 sm:$0xff]  }
 0x141   : > { %1331 = vmatprep.subr.bf16.mxu0 %v1317_v34  ;;  %1374 = vmatprep.subr.bf16.mxu1 %v1323_v35  ;;  %v2553_v11 = vld [vmem:[%s3920_s28 + $0x160] ss:$16 sps:$4 sm:$0xff]   ;;  %v2556_v12 = vld [vmem:[%s3920_s28 + $0x168] ss:$16 sps:$4 sm:$0xff]   ;;  %v2561_v13 = vld [vmem:[%s3920_s28 + $0x144] ss:$16 sps:$4 sm:$0xff]  }
 0x142   : > { %v2564_v14 = vld [vmem:[%s3920_s28 + $0x14c] ss:$16 sps:$4 sm:$0xff]   ;;  %v2567_v15 = vld [vmem:[%s3920_s28 + $0x264] ss:$16 sps:$4 sm:$0x3f]  }
 0x143   : > { %2145 = vmatmul.mubr.msk.bf16.vlgmr.msra.gmra.mxu0 %vm1090_vm2, %v3955_v36  ;;  %2146 = vmatmul.mubr.msk.bf16.vlgmr.msra.gmra.mxu1 %vm1090_vm2, %v3955_v36  ;;  %v2570_v16 = vld [vmem:[%s3920_s28 + $0x26c] ss:$16 sps:$4 sm:$0x3f]   ;;  %v2559_v17 = vld [vmem:[%s3920_s28 + $0x140] ss:$16 sps:$4 sm:$0xff]   ;;  %v1763_v21 = vand.u32 %v2567_v15, %v3915_v4 }
 0x144   : > { %1332 = vmatpush1.bf16.msra.mxu0 %v1314_v37  ;;  %1375 = vmatpush1.bf16.msra.mxu1 %v1320_v38  ;;  %v2562_v18 = vld [vmem:[%s3920_s28 + $0x148] ss:$16 sps:$4 sm:$0xff]   ;;  %v2565_v19 = vld [vmem:[%s3920_s28 + $0x260] ss:$16 sps:$4 sm:$0x3f]   ;;  %v1769_v22 = vand.u32 %v2570_v16, %v3915_v4 }
 0x145   : > { %1333 = vmatprep.subr.bf16.mxu0 %v2513_v39  ;;  %1376 = vmatprep.subr.bf16.mxu1 %v2516_v40  ;;  %v2568_v20 = vld [vmem:[%s3920_s28 + $0x268] ss:$16 sps:$4 sm:$0x3f]   ;;  %v1760_v23 = vand.u32 %v2565_v19, %v3915_v4  ;;  %v2573_v25 = vld [vmem:[%s3920_s28 + $0x244] ss:$16 sps:$4 sm:$0xff]  }
 0x146   : > { %1357 = vmatprep.mubr.bf16.mxu0 %v2788_v3  ;;  %1400 = vmatprep.mubr.bf16.mxu1 %v2788_v3  ;;  %v1766_v24 = vand.u32 %v2568_v20, %v3915_v4  ;;  %v2576_v26 = vld [vmem:[%s3920_s28 + $0x24c] ss:$16 sps:$4 sm:$0xff]   ;;  %v2571_v27 = vld [vmem:[%s3920_s28 + $0x240] ss:$16 sps:$4 sm:$0xff]   ;;  %v2574_v28 = vld [vmem:[%s3920_s28 + $0x248] ss:$16 sps:$4 sm:$0xff]  }
 0x147   : > { %v2579_v4 = vld [vmem:[%s3920_s28 + $0x224] ss:$16 sps:$4 sm:$0xff]   ;;  %v2582_v29 = vld [vmem:[%s3920_s28 + $0x22c] ss:$16 sps:$4 sm:$0xff]   ;;  %v2577_v30 = vld [vmem:[%s3920_s28 + $0x220] ss:$16 sps:$4 sm:$0xff]  }
 0x148   : > { %1334 = vmatpush1.bf16.msra.mxu0 %v2511_v41  ;;  %1377 = vmatpush1.bf16.msra.mxu1 %v2514_v42  ;;  %v2580_v31 = vld [vmem:[%s3920_s28 + $0x228] ss:$16 sps:$4 sm:$0xff]   ;;  %v2585_v32 = vld [vmem:[%s3920_s28 + $0x204] ss:$16 sps:$4 sm:$0xff]   ;;  %v2588_v33 = vld [vmem:[%s3920_s28 + $0x20c] ss:$16 sps:$4 sm:$0xff]  }
 0x149   : > { %1335 = vmatprep.subr.bf16.mxu0 %v2519_v43  ;;  %1378 = vmatprep.subr.bf16.mxu1 %v2522_v44  ;;  %v2583_v34 = vld [vmem:[%s3920_s28 + $0x200] ss:$16 sps:$4 sm:$0xff]   ;;  %v2586_v35 = vld [vmem:[%s3920_s28 + $0x208] ss:$16 sps:$4 sm:$0xff]   ;;  %v2591_v37 = vld [vmem:[%s3920_s28 + $0x1e4] ss:$16 sps:$4 sm:$0xff]  }
 0x14a   : > { %v2594_v38 = vld [vmem:[%s3920_s28 + $0x1ec] ss:$16 sps:$4 sm:$0xff]   ;;  %v2592_v39 = vld [vmem:[%s3920_s28 + $0x1e8] ss:$16 sps:$4 sm:$0xff]  }
 0x14c   : > { %1336 = vmatpush1.bf16.msra.mxu0 %v2517_v45  ;;  %1379 = vmatpush1.bf16.msra.mxu1 %v2520_v46 }
 0x14d   : > { %1337 = vmatprep.subr.bf16.mxu0 %v2525_v47  ;;  %1380 = vmatprep.subr.bf16.mxu1 %v2528_v48 }
 0x150   : > { %1338 = vmatpush1.bf16.msra.mxu0 %v2523_v49  ;;  %1381 = vmatpush1.bf16.msra.mxu1 %v2526_v50 }
 0x151   : > { %1339 = vmatprep.subr.bf16.mxu0 %v2531_v51  ;;  %1382 = vmatprep.subr.bf16.mxu1 %v2534_v53 }
 0x154   : > { %1340 = vmatpush1.bf16.msra.mxu0 %v2529_v55  ;;  %1383 = vmatpush1.bf16.msra.mxu1 %v2532_v56 }
 0x155   : > { %1554 = vmatprep.subr.bf16.mxu0 %v1540_v59  ;;  %1597 = vmatprep.subr.bf16.mxu1 %v1546_v60 }
 0x157   : > { %2187 = vmatmul.mubr.msk.bf16.vlgmr.msra.gmra.mxu0 %vm1090_vm2, %v3955_v36  ;;  %2188 = vmatmul.mubr.msk.bf16.vlgmr.msra.gmra.mxu1 %vm1090_vm2, %v3955_v36 }
 0x158   : > { %1555 = vmatpush1.bf16.msra.mxu0 %v1537_v61  ;;  %1598 = vmatpush1.bf16.msra.mxu1 %v1543_v62 }
 0x159   : > { %1556 = vmatprep.subr.bf16.mxu0 %v2543_v63  ;;  %1599 = vmatprep.subr.bf16.mxu1 %v2546_v0 }
 0x15a   : > { %1580 = vmatprep.mubr.bf16.mxu0 %v2788_v3  ;;  %1623 = vmatprep.mubr.bf16.mxu1 %v2788_v3 }
 0x15c   : > { %1557 = vmatpush1.bf16.msra.mxu0 %v2541_v1  ;;  %1600 = vmatpush1.bf16.msra.mxu1 %v2544_v2 }
 0x15d   : > { %1558 = vmatprep.subr.bf16.mxu0 %v2549_v5  ;;  %1601 = vmatprep.subr.bf16.mxu1 %v2552_v6 }
 0x160   : > { %1559 = vmatpush1.bf16.msra.mxu0 %v2547_v7  ;;  %1602 = vmatpush1.bf16.msra.mxu1 %v2550_v8 }
 0x161   : > { %1560 = vmatprep.subr.bf16.mxu0 %v2555_v9  ;;  %1603 = vmatprep.subr.bf16.mxu1 %v2558_v10 }
 0x164   : > { %1561 = vmatpush1.bf16.msra.mxu0 %v2553_v11  ;;  %1604 = vmatpush1.bf16.msra.mxu1 %v2556_v12 }
 0x165   : > { %1562 = vmatprep.subr.bf16.mxu0 %v2561_v13  ;;  %1605 = vmatprep.subr.bf16.mxu1 %v2564_v14 }
 0x168   : > { %1563 = vmatpush1.bf16.msra.mxu0 %v2559_v17  ;;  %1606 = vmatpush1.bf16.msra.mxu1 %v2562_v18 }
 0x169   : > { %1777 = vmatprep.subr.bf16.mxu0 %v1763_v21  ;;  %1820 = vmatprep.subr.bf16.mxu1 %v1769_v22 }
 0x16b   : > { %2229 = vmatmul.mubr.msk.bf16.vlgmr.msra.gmra.mxu0 %vm1090_vm2, %v3955_v36  ;;  %2230 = vmatmul.mubr.msk.bf16.vlgmr.msra.gmra.mxu1 %vm1090_vm2, %v3955_v36 }
 0x16c   : > { %1778 = vmatpush1.bf16.msra.mxu0 %v1760_v23  ;;  %1821 = vmatpush1.bf16.msra.mxu1 %v1766_v24 }
 0x16d   : > { %1779 = vmatprep.subr.bf16.mxu0 %v2573_v25  ;;  %1822 = vmatprep.subr.bf16.mxu1 %v2576_v26 }
 0x16e   : > { %1803 = vmatprep.mubr.bf16.mxu0 %v2788_v3  ;;  %1846 = vmatprep.mubr.bf16.mxu1 %v2788_v3  ;;  %v2589_v3 = vld [vmem:[%s3920_s28 + $0x1e0] ss:$16 sps:$4 sm:$0xff]  }
 0x170   : > { %1780 = vmatpush1.bf16.msra.mxu0 %v2571_v27  ;;  %1823 = vmatpush1.bf16.msra.mxu1 %v2574_v28 }
 0x171   : > { %1781 = vmatprep.subr.bf16.mxu0 %v2579_v4  ;;  %1824 = vmatprep.subr.bf16.mxu1 %v2582_v29 }
 0x174   : > { %1782 = vmatpush1.bf16.msra.mxu0 %v2577_v30  ;;  %1825 = vmatpush1.bf16.msra.mxu1 %v2580_v31 }
 0x175   : > { %1783 = vmatprep.subr.bf16.mxu0 %v2585_v32  ;;  %1826 = vmatprep.subr.bf16.mxu1 %v2588_v33 }
 0x178   : > { %1784 = vmatpush1.bf16.msra.mxu0 %v2583_v34  ;;  %1827 = vmatpush1.bf16.msra.mxu1 %v2586_v35 }
 0x179   : > { %1785 = vmatprep.subr.bf16.mxu0 %v2591_v37  ;;  %1828 = vmatprep.subr.bf16.mxu1 %v2594_v38 }
 0x17c   : > { %1786 = vmatpush1.bf16.msra.mxu0 %v2589_v3  ;;  %1829 = vmatpush1.bf16.msra.mxu1 %v2592_v39 }
 0x17f   : > { %2271 = vmatmul.mubr.msk.bf16.vlgmr.msra.gmra.mxu0 %vm1090_vm2, %v3955_v36  ;;  %2272 = vmatmul.mubr.msk.bf16.vlgmr.msra.gmra.mxu1 %vm1090_vm2, %v3955_v36 }
 0x1a8   : > { %v1870_v11 = vpop.permute.xlu0 %1869 }
 0x1ac   : > { %v1875_v39 = vpop.permute.xlu0 %1874 }
 0x203   : > { %v1144_v40 = vpop.f32.mrf.mxu0  ;;  %v1187_v41 = vpop.f32.mrf.mxu1 }
 0x205   : > { %v1146_v42 = vpop.f32.mrf.mxu0  ;;  %v1189_v43 = vpop.f32.mrf.mxu1 }
 0x207   : > { %v1148_v44 = vpop.f32.mrf.mxu0  ;;  %v1191_v45 = vpop.f32.mrf.mxu1 }
 0x209   : > { %v1150_v46 = vpop.f32.mrf.mxu0  ;;  %v1193_v47 = vpop.f32.mrf.mxu1 }
 0x217   : > { %v1359_v48 = vpop.f32.mrf.mxu0  ;;  %v1402_v49 = vpop.f32.mrf.mxu1 }
 0x218   : > { %v1411_v61 = vmax.f32 %v1144_v40, %v1359_v48  ;;  %v1413_v62 = vmax.f32 %v1187_v41, %v1402_v49 }
 0x219   : > { %v1361_v50 = vpop.f32.mrf.mxu0  ;;  %v1404_v51 = vpop.f32.mrf.mxu1 }
 0x21a   : > { %v1412_v1 = vmax.f32 %v1146_v42, %v1361_v50  ;;  %v1414_v2 = vmax.f32 %v1189_v43, %v1404_v51 }
 0x21b   : > { %v1363_v52 = vpop.f32.mrf.mxu0  ;;  %v1406_v53 = vpop.f32.mrf.mxu1 }
 0x21c   : > { %v1415_v14 = vmax.f32 %v1148_v44, %v1363_v52  ;;  %v1417_v15 = vmax.f32 %v1191_v45, %v1406_v53 }
 0x21d   : > { %v1365_v54 = vpop.f32.mrf.mxu0  ;;  %v1408_v55 = vpop.f32.mrf.mxu1 }
 0x21e   : > { %v1416_v16 = vmax.f32 %v1150_v46, %v1365_v54  ;;  %v1418_v17 = vmax.f32 %v1193_v47, %v1408_v55 }
 0x22b   : > { %v1582_v56 = vpop.f32.mrf.mxu0  ;;  %v1625_v57 = vpop.f32.mrf.mxu1 }
 0x22c   : > { %v1634_v5 = vmax.f32 %v1411_v61, %v1582_v56  ;;  %v1636_v6 = vmax.f32 %v1413_v62, %v1625_v57 }
 0x22d   : > { %v1584_v58 = vpop.f32.mrf.mxu0  ;;  %v1627_v36 = vpop.f32.mrf.mxu1 }
 0x22e   : > { %v1635_v9 = vmax.f32 %v1412_v1, %v1584_v58  ;;  %v1637_v10 = vmax.f32 %v1414_v2, %v1627_v36 }
 0x22f   : > { %v1586_v59 = vpop.f32.mrf.mxu0  ;;  %v1629_v60 = vpop.f32.mrf.mxu1 }
 0x230   : > { %v1638_v24 = vmax.f32 %v1415_v14, %v1586_v59  ;;  %v1640_v25 = vmax.f32 %v1417_v15, %v1629_v60 }
 0x231   : > { %v1588_v63 = vpop.f32.mrf.mxu0  ;;  %v1631_v0 = vpop.f32.mrf.mxu1 }
 0x232   : > { %v1639_v28 = vmax.f32 %v1416_v16, %v1588_v63  ;;  %v1641_v4 = vmax.f32 %v1418_v17, %v1631_v0 }
 0x23f   : > { %v1805_v7 = vpop.f32.mrf.mxu0  ;;  %v1848_v8 = vpop.f32.mrf.mxu1 }
 0x240   : > { %v1857_v12 = vmax.f32 %v1634_v5, %v1805_v7  ;;  %v1859_v13 = vmax.f32 %v1636_v6, %v1848_v8 }
 0x241   : > { %v1807_v18 = vpop.f32.mrf.mxu0  ;;  %v1850_v19 = vpop.f32.mrf.mxu1 }
 0x242   : > { %v1877_v20 = vadd.f32 %v1870_v11, %v1857_v12  ;;  %v1879_v21 = vadd.f32 %v1870_v11, %v1859_v13  ;;  %v1858_v22 = vmax.f32 %v1635_v9, %v1807_v18  ;;  %v1860_v23 = vmax.f32 %v1637_v10, %v1850_v19 }
 0x243   : > { %v1809_v26 = vpop.f32.mrf.mxu0  ;;  %v1852_v27 = vpop.f32.mrf.mxu1 }
 0x244   : > { %v1878_v29 = vadd.f32 %v1870_v11, %v1858_v22  ;;  %v1880_v30 = vadd.f32 %v1870_v11, %v1860_v23  ;;  %v1885_v31 = vmax.f32 %v1877_v20, 0.0  ;;  %v1887_v32 = vmax.f32 %v1879_v21, 0.0 }
 0x245   : > { %v1861_v33 = vmax.f32 %v1638_v24, %v1809_v26  ;;  %v1863_v34 = vmax.f32 %v1640_v25, %v1852_v27  ;;  %v1811_v35 = vpop.f32.mrf.mxu0  ;;  %v1854_v37 = vpop.f32.mrf.mxu1 }
 0x246   : > { %v1886_v38 = vmax.f32 %v1878_v29, 0.0  ;;  %v1888_v3 = vmax.f32 %v1880_v30, 0.0  ;;  %v1862_v40 = vmax.f32 %v1639_v28, %v1811_v35  ;;  %v1864_v41 = vmax.f32 %v1641_v4, %v1854_v37 }
 0x247   : > { %v1881_v42 = vadd.f32 %v1875_v39, %v1861_v33  ;;  %v1883_v43 = vadd.f32 %v1875_v39, %v1863_v34 }
 0x248   : > { %v2292_v44 = vpack.c.bf16 %v1886_v38, %v1885_v31  ;;  %v2293_v45 = vpack.c.bf16 %v1888_v3, %v1887_v32  ;;  %v1882_v46 = vadd.f32 %v1875_v39, %v1862_v40  ;;  %v1884_v47 = vadd.f32 %v1875_v39, %v1864_v41 }
 0x249   : > { %v1889_v48 = vmax.f32 %v1881_v42, 0.0  ;;  %v1891_v49 = vmax.f32 %v1883_v43, 0.0 }
 0x24a   : > { %1917 = vst [vmem:[%s955_s20] sm:$0xff] %v2292_v44  ;;  %1918 = vst [vmem:[%s955_s20 + $0x8] sm:$0xff] %v2293_v45  ;;  %v1890_v50 = vmax.f32 %v1882_v46, 0.0  ;;  %v1892_v51 = vmax.f32 %v1884_v47, 0.0  ;;  %1928 = sbr.rel (!%p2851_p6) target bundleno = 619 (0x26b), region = 102 }
 0x24c   : > { %v2294_v52 = vpack.c.bf16 %v1890_v50, %v1889_v48  ;;  %v2295_v53 = vpack.c.bf16 %v1892_v51, %v1891_v49 }
 0x24e   : > { %1919 = vst [vmem:[%s955_s20 + $0x10] sm:$0x11] %v2294_v52  ;;  %1920 = vst [vmem:[%s955_s20 + $0x18] sm:$0x11] %v2295_v53 }
 0x24f   : > { %s4155_s27 = smov (!%p1931_p5, %s1930_s27), 4 }
 0x250   : > { %s4053_s19 = sshll.u32 %s4155_s27, 7 }
 0x251   : > { %s1935_s11 = ssub.s32 512, %s4053_s19 }
 0x252   : > { %1936 = vsyncadd %s1922_s17, %s1935_s11  ;;  %p2280_p6 = scmp.ne.s32.totalorder %s4053_s19, 0  ;;  %s2296_s22 = sshll.u32 %s2833_s16, 8 }
 0x253   : > { %s4063_s30 = scalar_lea.hbm %s4115_s3, %s2296_s22  ;;  %s2282_s10 = sshll.u32 %s4155_s27, 2 }
 0x254   : > { %s1942_s4 = sshll.u32 %s955_s20, 4  ;;  %s2789_s26 = smov [#allocation3]   ;;  %s4066_s4 = int_to_ptr.vmem [resolvable:$true] %s1942_s4 }
 0x255   : > { %s2595_s7 = scalar_lea.vmem %s4066_s4, %s4053_s19  ;;  %s2599_s24 = sshll.u32 %s2789_s26, 4  ;;  %s2600_s24 = int_to_ptr.vmem [resolvable:$false] %s2599_s24 }
 0x256   : > { %p2596_p7 = scmp.ne.s32.totalorder %s4066_s4, %s2595_s7  ;;  %s2601_s16 = scalar_lea.vmem %s2600_s24, 1024 }
 0x257   : > { %p2602_p11 = scmp.lt.s32.totalorder %s4066_s4, %s2600_s24  ;;  %p2603_p12 = scmp.lt.s32.totalorder %s2601_s16, %s2595_s7 }
 0x258   : > { %p2597_p9 = pnand %p2596_p7, %p2280_p6 }
 0x259   : > { %p2604_p13 = por %p2603_p12, %p2602_p11 }
 0x25a   : > { %p2598_p10 = pneg %p2597_p9 }
 0x25c   : > { %p2605_p0 = pnand %p2604_p13, %p2598_p10 }
 0x25e   : > { %2608 = shalt.err (!%p2605_p0)
}
 0x25f   : > { %s2609_s28 = scalar_lea.hbm %s4063_s30, %s4053_s19  ;;  %s2613_s29 = scalar_lea.hbm %s4115_s3, 1920 }
 0x260   : > { %p2610_p1 = scmp.ne.s32.totalorder %s4063_s30, %s2609_s28  ;;  %p2614_p4 = scmp.lt.s32.totalorder %s4063_s30, %s4115_s3 }
 0x261   : > { %p2615_p5 = scmp.lt.s32.totalorder %s2613_s29, %s2609_s28 }
 0x262   : > { %p2611_p2 = pnand %p2610_p1, %p2280_p6 }
 0x263   : > { %p2616_p7 = por %p2615_p5, %p2614_p4 }
 0x264   : > { %p2612_p3 = pneg %p2611_p2 }
 0x266   : > { %p2617_p9 = pnand %p2616_p7, %p2612_p3 }
 0x268   : > { %2620 = shalt.err (!%p2617_p9)
}
 0x269   : > { %s2790_s11 = smov 256   ;;  %s2791_s22 = smov 960  }
 0x26a   : > { %1948 = dma.vmem_to_hbm [thread:$0]  (%p2280_p6), %s4066_s4, %s4053_s19, %s4063_s30, %s1922_s17, %s2790_s11, %s2791_s22, %s2282_s10  }
 0x26b PF: > { %p2306_p10 = scmp.ge.s32.totalorder %s2719_s15, 2  ;;  %s1957_s0 = sand.u32 1, %s2707_s12  }
 0x26c   : > { %s1958_s8 = scalar_lea.sflag [#allocation4], %s1957_s0 }
 0x26d   : > { %p2303_p11 = pnand %p2306_p10, %p2855_p8 }
 0x26f   : > { %p2304_p12 = pneg %p2303_p11 }
 0x271   : > { %2702 = dma.done.wait (%p2304_p12), %s1958_s8, 512  }
 0x272   : > { %2704 = vsyncadd (%p2304_p12), %s1958_s8, 4294966784  ;;  %p13_p13 = scmp.ge.s32.totalorder %s2837_s18, 6   ;;  %s4140_s12 = smov %s2711_s13 }
 0x273   : > { %s4141_s13 = smov %s2715_s14  ;;  %s4142_s14 = smov %s2849_s21 }
 0x274   : > { %s4143_s15 = smov %s2837_s18  ;;  %15 = sbr.rel (!%p13_p13) target bundleno = 5 (0x5), region = 203 }
 0x279   :  { %1963 = vsyncpa [#allocation4], 1 }
 0x27a   :  { %1965 = vsyncpa [#allocation4 + $0x1], 1 }

</bundles_post_ra>
